<compile_context>
chip_gen: v6e
topology: v6e:2x2x1
jax: 0.10.0
libtpu: 0.0.40
codegen_flags: <defaults>
</compile_context>

<pallas_src>
import jax
import jax.numpy as jnp
from jax.experimental import pallas as pl
from jax.experimental.pallas import tpu as pltpu


# ------------------------------ fused kernel ---------------------------------
def _make_fused_kernel(num_layers):
    def kernel(*refs):
        # refs: x(B,T), lens(B,1), [w_ih, w_hh, b] * num_layers, lin_w, lin_b, out
        x_ref, len_ref = refs[0], refs[1]
        layer_refs = refs[2:2 + 3 * num_layers]
        lw_ref, lb_ref, out_ref = refs[-3], refs[-2], refs[-1]

        B, T = x_ref.shape
        H = layer_refs[1].shape[0]          # w_hh of layer 0 is (H, 4H)
        G = 4 * H

        # ---- hoisted loop invariants (computed once per grid step) ----------
        lane = jax.lax.broadcasted_iota(jnp.int32, (B, G), 1)
        is_g = (lane >= 2 * H) & (lane < 3 * H)        # 'g' gate lanes (i,f,g,o order)
        lens = len_ref[...]                            # (B, 1) float32
        inv_len = pl.reciprocal(jnp.maximum(lens, 1.0), approx=False)  # (B, 1)

        x = x_ref[...]                                  # (B, T)

        seq_stack = None            # (T*B, H) stacked outputs of previous layer
        acc = None                  # (B, H) masked-sum accumulator (last layer)

        for layer in range(num_layers):
            w_ih = layer_refs[3 * layer][...]           # (Din, 4H)
            w_hh = layer_refs[3 * layer + 1][...]       # (H, 4H)
            b = layer_refs[3 * layer + 2][...]          # (1, 4H)
            din = w_ih.shape[0]
            is_last = (layer == num_layers - 1)

            # ---- non-recurrent input projection, hoisted out of the chain ---
            if din == 1:
                # Layer 0: scalar input per (b, t).  Hoist the (1,4H)->(B,4H)
                # broadcasts once; each step is then a single VPU mul+add.
                wib = jnp.broadcast_to(w_ih, (B, G))
                bb = jnp.broadcast_to(b, (B, G))
                xz_steps = [x[:, t:t + 1] * wib + bb for t in range(T)]
            else:
                # ONE MXU matmul for all T timesteps: (T*B, H) @ (H, 4H).
                xz_all = jnp.dot(seq_stack, w_ih,
                                 preferred_element_type=jnp.float32) + b
                xz_steps = [xz_all[t * B:(t + 1) * B, :] for t in range(T)]

            h = jnp.zeros((B, H), jnp.float32)
            c = jnp.zeros((B, H), jnp.float32)
            outs = []
            if is_last:
                acc = jnp.zeros((B, H), jnp.float32)

            for t in range(T):                          # fully unrolled (T static)
                if t == 0:
                    z = xz_steps[0]                     # h0 == 0 -> skip h @ w_hh
                else:
                    z = xz_steps[t] + jnp.dot(h, w_hh,
                                              preferred_element_type=jnp.float32)
                # Single transcendental pass: sigmoid(x) = 0.5*(1 + tanh(x/2)).
                pre = jnp.where(is_g, z, 0.5 * z)
                th = jnp.tanh(pre)
                act = jnp.where(is_g, th, 0.5 * th + 0.5)
                gi = act[:, 0 * H:1 * H]
                gf = act[:, 1 * H:2 * H]
                gg = act[:, 2 * H:3 * H]
                go = act[:, 3 * H:4 * H]
                c = gf * c + gi * gg
                h = go * jnp.tanh(c)
                if is_last:
                    # Fused length-masked sum (padding is trailing -> causal safe).
                    acc = acc + jnp.where(lens > float(t), h, 0.0)
                else:
                    outs.append(h)

            if not is_last:
                # Stack outputs (rows grouped by timestep) for the next layer's
                # single batched projection.  Sublane-aligned (B multiple of 8).
                seq_stack = jnp.concatenate(outs, axis=0)   # (T*B, H)

        mean = acc * inv_len                                # (B, H)
        out_ref[...] = (jnp.dot(mean, lw_ref[...],
                                preferred_element_type=jnp.float32)
                        + lb_ref[...])

    return kernel


def fused_forward(x2d, lens, layer_params, lin_w, lin_b, *, batch_block=8):
    B, T = x2d.shape
    C = lin_w.shape[1]
    num_layers = len(layer_params)

    # Pad batch to a sublane-full multiple of 8 so each grid step works on
    # full vreg sublanes and the batch grid can be marked "parallel"
    # (lets v7x's two TensorCores split the batch).
    BB = batch_block
    B_pad = ((B + BB - 1) // BB) * BB
    if B_pad != B:
        x2d = jnp.pad(x2d, ((0, B_pad - B), (0, 0)))
        lens = jnp.pad(lens, ((0, B_pad - B), (0, 0)))
    n_tiles = B_pad // BB

    flat_weights = []
    for (w_ih, w_hh, b) in layer_params:
        flat_weights += [w_ih, w_hh, b]

    def full_spec(a):
        return pl.BlockSpec(a.shape, lambda i: (0, 0))

    in_specs = ([pl.BlockSpec((BB, T), lambda i: (i, 0)),
                 pl.BlockSpec((BB, 1), lambda i: (i, 0))]
                + [full_spec(a) for a in flat_weights]
                + [full_spec(lin_w), full_spec(lin_b)])

    out = pl.pallas_call(
        _make_fused_kernel(num_layers),
        out_shape=jax.ShapeDtypeStruct((B_pad, C), jnp.float32),
        grid=(n_tiles,),
        in_specs=in_specs,
        out_specs=pl.BlockSpec((BB, C), lambda i: (i, 0)),
        compiler_params=pltpu.CompilerParams(dimension_semantics=("parallel",)),
    )(x2d, lens, *flat_weights, lin_w, lin_b)
    return out[:B]


# ------------------------------- model wrapper --------------------------------
def init_params(key, hidden_size, rnn_layers, class_count, input_size=1):
    params = {"layers": []}
    k = 1.0 / jnp.sqrt(jnp.float32(hidden_size))
    for layer in range(rnn_layers):
        din = input_size if layer == 0 else hidden_size
        key, k1, k2, k3, k4 = jax.random.split(key, 5)
        w_ih = jax.random.uniform(k1, (din, 4 * hidden_size), jnp.float32, -k, k)
        w_hh = jax.random.uniform(k2, (hidden_size, 4 * hidden_size), jnp.float32, -k, k)
        b_ih = jax.random.uniform(k3, (1, 4 * hidden_size), jnp.float32, -k, k)
        b_hh = jax.random.uniform(k4, (1, 4 * hidden_size), jnp.float32, -k, k)
        params["layers"].append((w_ih, w_hh, b_ih + b_hh))
    key, k5, k6 = jax.random.split(key, 3)
    kl = 1.0 / jnp.sqrt(jnp.float32(hidden_size))
    params["lin_w"] = jax.random.uniform(k5, (hidden_size, class_count), jnp.float32, -kl, kl)
    params["lin_b"] = jax.random.uniform(k6, (1, class_count), jnp.float32, -kl, kl)
    return params


def model_forward(params, x_btd, lengths):
    # x_btd: (B, T, 1) batch-first padded, lengths: (B,) int
    # TODO(synk): inter-layer LSTM dropout (rnn_dropout) is treated as identity (inference mode).
    B, T, _ = x_btd.shape
    x2d = x_btd.reshape(B, T).astype(jnp.float32)
    lens = lengths.astype(jnp.float32).reshape(B, 1)
    return fused_forward(x2d, lens, params["layers"], params["lin_w"], params["lin_b"])


# ----------------------------- pure-JAX reference -----------------------------
def _ref_forward(params, x_btd, lengths):
    x = x_btd.astype(jnp.float32)                            # (B, T, 1)
    B, T, _ = x.shape
    h_seq = x
    for (w_ih, w_hh, b) in params["layers"]:
        H = w_hh.shape[0]

        def step(carry, x_t):
            h, c = carry
            z = x_t @ w_ih + h @ w_hh + b
            i = jax.nn.sigmoid(z[:, 0 * H:1 * H])
            f = jax.nn.sigmoid(z[:, 1 * H:2 * H])
            g = jnp.tanh(z[:, 2 * H:3 * H])
            o = jax.nn.sigmoid(z[:, 3 * H:4 * H])
            c = f * c + i * g
            h = o * jnp.tanh(c)
            return (h, c), h

        xs = jnp.transpose(h_seq, (1, 0, 2))                 # (T, B, Din)
        (_, _), ys = jax.lax.scan(step, (jnp.zeros((B, H)), jnp.zeros((B, H))), xs)
        h_seq = jnp.transpose(ys, (1, 0, 2))                 # (B, T, H)
    lens_b = lengths.astype(jnp.float32)
    mask = (jnp.arange(T, dtype=jnp.float32)[None, :] < lens_b[:, None]).astype(jnp.float32)
    summed = jnp.einsum("bt,bth->bh", mask, h_seq)
    mean = summed / jnp.maximum(lens_b, 1.0)[:, None]
    return mean @ params["lin_w"] + params["lin_b"]


if __name__ == "__main__":
    # args: hidden_size=32, rnn_layers=2, rnn_dropout=0.0 (identity), class_count=5
    B, T, H, L, C = 4, 8, 32, 2, 5
    key = jax.random.PRNGKey(0)
    key, kx = jax.random.split(key)
    x = jax.random.normal(kx, (B, T, 1), jnp.float32)
    lengths = jnp.array([8, 5, 3, 7], dtype=jnp.int32)

    params = init_params(key, hidden_size=H, rnn_layers=L, class_count=C)

    out = model_forward(params, x, lengths)
    out = jax.block_until_ready(out)
    assert out.shape == (B, C) and out.dtype == jnp.float32

    ref = jax.block_until_ready(_ref_forward(params, x, lengths))
    assert jnp.all(jnp.isfinite(out))
    assert jnp.allclose(out, ref, atol=1e-3, rtol=1e-3)
    print("KERNEL_OK")
</pallas_src>

<mosaic_0001>
module attributes {stable_mosaic.version = 11 : i64} {
  func.func @kernel(%arg0: i32, %arg1: memref<8x8xf32, #tpu.memory_space<vmem>>, %arg2: memref<8x1xf32, #tpu.memory_space<vmem>>, %arg3: memref<1x128xf32, #tpu.memory_space<vmem>>, %arg4: memref<32x128xf32, #tpu.memory_space<vmem>>, %arg5: memref<1x128xf32, #tpu.memory_space<vmem>>, %arg6: memref<32x128xf32, #tpu.memory_space<vmem>>, %arg7: memref<32x128xf32, #tpu.memory_space<vmem>>, %arg8: memref<1x128xf32, #tpu.memory_space<vmem>>, %arg9: memref<32x5xf32, #tpu.memory_space<vmem>>, %arg10: memref<1x5xf32, #tpu.memory_space<vmem>>, %arg11: memref<8x5xf32, #tpu.memory_space<vmem>>) attributes {dimension_semantics = [#tpu.dimension_semantics<parallel>], iteration_bounds = array<i64: 1>, scalar_prefetch = 0 : i64, scratch_operands = 0 : i64, tpu.core_type = #tpu.core_type<tc>, window_params = [{transform_indices = @transform_0, window_bounds = array<i64: 8, 8>}, {transform_indices = @transform_1, window_bounds = array<i64: 8, 1>}, {pipeline_mode = #tpu.pipeline_mode<synchronous>, transform_indices = @transform_2, window_bounds = array<i64: 1, 128>}, {pipeline_mode = #tpu.pipeline_mode<synchronous>, transform_indices = @transform_3, window_bounds = array<i64: 32, 128>}, {pipeline_mode = #tpu.pipeline_mode<synchronous>, transform_indices = @transform_4, window_bounds = array<i64: 1, 128>}, {pipeline_mode = #tpu.pipeline_mode<synchronous>, transform_indices = @transform_5, window_bounds = array<i64: 32, 128>}, {pipeline_mode = #tpu.pipeline_mode<synchronous>, transform_indices = @transform_6, window_bounds = array<i64: 32, 128>}, {pipeline_mode = #tpu.pipeline_mode<synchronous>, transform_indices = @transform_7, window_bounds = array<i64: 1, 128>}, {pipeline_mode = #tpu.pipeline_mode<synchronous>, transform_indices = @transform_8, window_bounds = array<i64: 32, 5>}, {pipeline_mode = #tpu.pipeline_mode<synchronous>, transform_indices = @transform_9, window_bounds = array<i64: 1, 5>}, {transform_indices = @transform_10, window_bounds = array<i64: 8, 5>}]} {
    %0 = tpu.iota {dimensions = array<i32: 1>} : vector<8x128xi32>
    %c64_i32 = arith.constant 64 : i32
    %1 = vector.broadcast %c64_i32 : i32 to vector<8x128xi32>
    %2 = arith.cmpi sge, %0, %1 : vector<8x128xi32>
    %c96_i32 = arith.constant 96 : i32
    %3 = vector.broadcast %c96_i32 : i32 to vector<8x128xi32>
    %4 = arith.cmpi slt, %0, %3 : vector<8x128xi32>
    %5 = arith.andi %2, %4 : vector<8x128xi1>
    %c0 = arith.constant 0 : index
    %c0_0 = arith.constant 0 : index
    %6 = vector.load %arg2[%c0, %c0_0] : memref<8x1xf32, #tpu.memory_space<vmem>>, vector<8x1xf32>
    %cst = arith.constant 1.000000e+00 : f32
    %7 = vector.broadcast %cst : f32 to vector<8x1xf32>
    %8 = arith.maximumf %6, %7 : vector<8x1xf32>
    %9 = tpu.reciprocal %8 : vector<8x1xf32> -> vector<8x1xf32>
    %c0_1 = arith.constant 0 : index
    %c0_2 = arith.constant 0 : index
    %10 = vector.load %arg1[%c0_1, %c0_2] : memref<8x8xf32, #tpu.memory_space<vmem>>, vector<8x8xf32>
    %c0_3 = arith.constant 0 : index
    %c0_4 = arith.constant 0 : index
    %11 = vector.load %arg3[%c0_3, %c0_4] : memref<1x128xf32, #tpu.memory_space<vmem>>, vector<1x128xf32>
    %c0_5 = arith.constant 0 : index
    %c0_6 = arith.constant 0 : index
    %12 = vector.load %arg4[%c0_5, %c0_6] : memref<32x128xf32, #tpu.memory_space<vmem>>, vector<32x128xf32>
    %c0_7 = arith.constant 0 : index
    %c0_8 = arith.constant 0 : index
    %13 = vector.load %arg5[%c0_7, %c0_8] : memref<1x128xf32, #tpu.memory_space<vmem>>, vector<1x128xf32>
    %14 = vector.shape_cast %11 : vector<1x128xf32> to vector<1x128xf32>
    %15 = vector.broadcast %14 : vector<1x128xf32> to vector<8x128xf32>
    %16 = vector.shape_cast %13 : vector<1x128xf32> to vector<1x128xf32>
    %17 = vector.broadcast %16 : vector<1x128xf32> to vector<8x128xf32>
    %18 = vector.extract_strided_slice %10 {offsets = [0, 0], sizes = [8, 1], strides = [1, 1]} : vector<8x8xf32> to vector<8x1xf32>
    %19 = vector.broadcast %18 : vector<8x1xf32> to vector<8x128xf32>
    %20 = arith.mulf %19, %15 : vector<8x128xf32>
    %21 = arith.addf %20, %17 : vector<8x128xf32>
    %22 = vector.extract_strided_slice %10 {offsets = [0, 1], sizes = [8, 1], strides = [1, 1]} : vector<8x8xf32> to vector<8x1xf32>
    %23 = vector.broadcast %22 : vector<8x1xf32> to vector<8x128xf32>
    %24 = arith.mulf %23, %15 : vector<8x128xf32>
    %25 = arith.addf %24, %17 : vector<8x128xf32>
    %26 = vector.extract_strided_slice %10 {offsets = [0, 2], sizes = [8, 1], strides = [1, 1]} : vector<8x8xf32> to vector<8x1xf32>
    %27 = vector.broadcast %26 : vector<8x1xf32> to vector<8x128xf32>
    %28 = arith.mulf %27, %15 : vector<8x128xf32>
    %29 = arith.addf %28, %17 : vector<8x128xf32>
    %30 = vector.extract_strided_slice %10 {offsets = [0, 3], sizes = [8, 1], strides = [1, 1]} : vector<8x8xf32> to vector<8x1xf32>
    %31 = vector.broadcast %30 : vector<8x1xf32> to vector<8x128xf32>
    %32 = arith.mulf %31, %15 : vector<8x128xf32>
    %33 = arith.addf %32, %17 : vector<8x128xf32>
    %34 = vector.extract_strided_slice %10 {offsets = [0, 4], sizes = [8, 1], strides = [1, 1]} : vector<8x8xf32> to vector<8x1xf32>
    %35 = vector.broadcast %34 : vector<8x1xf32> to vector<8x128xf32>
    %36 = arith.mulf %35, %15 : vector<8x128xf32>
    %37 = arith.addf %36, %17 : vector<8x128xf32>
    %38 = vector.extract_strided_slice %10 {offsets = [0, 5], sizes = [8, 1], strides = [1, 1]} : vector<8x8xf32> to vector<8x1xf32>
    %39 = vector.broadcast %38 : vector<8x1xf32> to vector<8x128xf32>
    %40 = arith.mulf %39, %15 : vector<8x128xf32>
    %41 = arith.addf %40, %17 : vector<8x128xf32>
    %42 = vector.extract_strided_slice %10 {offsets = [0, 6], sizes = [8, 1], strides = [1, 1]} : vector<8x8xf32> to vector<8x1xf32>
    %43 = vector.broadcast %42 : vector<8x1xf32> to vector<8x128xf32>
    %44 = arith.mulf %43, %15 : vector<8x128xf32>
    %45 = arith.addf %44, %17 : vector<8x128xf32>
    %46 = vector.extract_strided_slice %10 {offsets = [0, 7], sizes = [8, 1], strides = [1, 1]} : vector<8x8xf32> to vector<8x1xf32>
    %47 = vector.broadcast %46 : vector<8x1xf32> to vector<8x128xf32>
    %48 = arith.mulf %47, %15 : vector<8x128xf32>
    %49 = arith.addf %48, %17 : vector<8x128xf32>
    %cst_9 = arith.constant 0.000000e+00 : f32
    %50 = vector.broadcast %cst_9 : f32 to vector<8x32xf32>
    %cst_10 = arith.constant 5.000000e-01 : f32
    %51 = vector.broadcast %cst_10 : f32 to vector<8x128xf32>
    %52 = arith.mulf %51, %21 : vector<8x128xf32>
    %53 = arith.select %5, %21, %52 : vector<8x128xi1>, vector<8x128xf32>
    %54 = math.tanh %53 : vector<8x128xf32>
    %cst_11 = arith.constant 5.000000e-01 : f32
    %55 = vector.broadcast %cst_11 : f32 to vector<8x128xf32>
    %56 = arith.mulf %55, %54 : vector<8x128xf32>
    %cst_12 = arith.constant 5.000000e-01 : f32
    %57 = vector.broadcast %cst_12 : f32 to vector<8x128xf32>
    %58 = arith.addf %56, %57 : vector<8x128xf32>
    %59 = arith.select %5, %54, %58 : vector<8x128xi1>, vector<8x128xf32>
    %60 = vector.extract_strided_slice %59 {offsets = [0, 0], sizes = [8, 32], strides = [1, 1]} : vector<8x128xf32> to vector<8x32xf32>
    %61 = vector.extract_strided_slice %59 {offsets = [0, 32], sizes = [8, 32], strides = [1, 1]} : vector<8x128xf32> to vector<8x32xf32>
    %62 = vector.extract_strided_slice %59 {offsets = [0, 64], sizes = [8, 32], strides = [1, 1]} : vector<8x128xf32> to vector<8x32xf32>
    %63 = vector.extract_strided_slice %59 {offsets = [0, 96], sizes = [8, 32], strides = [1, 1]} : vector<8x128xf32> to vector<8x32xf32>
    %64 = arith.mulf %61, %50 : vector<8x32xf32>
    %65 = arith.mulf %60, %62 : vector<8x32xf32>
    %66 = arith.addf %64, %65 : vector<8x32xf32>
    %67 = math.tanh %66 : vector<8x32xf32>
    %68 = arith.mulf %63, %67 : vector<8x32xf32>
    %cst_13 = arith.constant dense<0.000000e+00> : vector<8x128xf32>
    %69 = tpu.matmul %68, %12, %cst_13 {dimension_numbers = #tpu.dot_dimension_numbers<[1], [0], [0], [1], [0, 0, 1, 1], [], []>} : vector<8x32xf32>, vector<32x128xf32>, vector<8x128xf32> -> vector<8x128xf32>
    %70 = arith.addf %25, %69 : vector<8x128xf32>
    %cst_14 = arith.constant 5.000000e-01 : f32
    %71 = vector.broadcast %cst_14 : f32 to vector<8x128xf32>
    %72 = arith.mulf %71, %70 : vector<8x128xf32>
    %73 = arith.select %5, %70, %72 : vector<8x128xi1>, vector<8x128xf32>
    %74 = math.tanh %73 : vector<8x128xf32>
    %cst_15 = arith.constant 5.000000e-01 : f32
    %75 = vector.broadcast %cst_15 : f32 to vector<8x128xf32>
    %76 = arith.mulf %75, %74 : vector<8x128xf32>
    %cst_16 = arith.constant 5.000000e-01 : f32
    %77 = vector.broadcast %cst_16 : f32 to vector<8x128xf32>
    %78 = arith.addf %76, %77 : vector<8x128xf32>
    %79 = arith.select %5, %74, %78 : vector<8x128xi1>, vector<8x128xf32>
    %80 = vector.extract_strided_slice %79 {offsets = [0, 0], sizes = [8, 32], strides = [1, 1]} : vector<8x128xf32> to vector<8x32xf32>
    %81 = vector.extract_strided_slice %79 {offsets = [0, 32], sizes = [8, 32], strides = [1, 1]} : vector<8x128xf32> to vector<8x32xf32>
    %82 = vector.extract_strided_slice %79 {offsets = [0, 64], sizes = [8, 32], strides = [1, 1]} : vector<8x128xf32> to vector<8x32xf32>
    %83 = vector.extract_strided_slice %79 {offsets = [0, 96], sizes = [8, 32], strides = [1, 1]} : vector<8x128xf32> to vector<8x32xf32>
    %84 = arith.mulf %81, %66 : vector<8x32xf32>
    %85 = arith.mulf %80, %82 : vector<8x32xf32>
    %86 = arith.addf %84, %85 : vector<8x32xf32>
    %87 = math.tanh %86 : vector<8x32xf32>
    %88 = arith.mulf %83, %87 : vector<8x32xf32>
    %cst_17 = arith.constant dense<0.000000e+00> : vector<8x128xf32>
    %89 = tpu.matmul %88, %12, %cst_17 {dimension_numbers = #tpu.dot_dimension_numbers<[1], [0], [0], [1], [0, 0, 1, 1], [], []>} : vector<8x32xf32>, vector<32x128xf32>, vector<8x128xf32> -> vector<8x128xf32>
    %90 = arith.addf %29, %89 : vector<8x128xf32>
    %cst_18 = arith.constant 5.000000e-01 : f32
    %91 = vector.broadcast %cst_18 : f32 to vector<8x128xf32>
    %92 = arith.mulf %91, %90 : vector<8x128xf32>
    %93 = arith.select %5, %90, %92 : vector<8x128xi1>, vector<8x128xf32>
    %94 = math.tanh %93 : vector<8x128xf32>
    %cst_19 = arith.constant 5.000000e-01 : f32
    %95 = vector.broadcast %cst_19 : f32 to vector<8x128xf32>
    %96 = arith.mulf %95, %94 : vector<8x128xf32>
    %cst_20 = arith.constant 5.000000e-01 : f32
    %97 = vector.broadcast %cst_20 : f32 to vector<8x128xf32>
    %98 = arith.addf %96, %97 : vector<8x128xf32>
    %99 = arith.select %5, %94, %98 : vector<8x128xi1>, vector<8x128xf32>
    %100 = vector.extract_strided_slice %99 {offsets = [0, 0], sizes = [8, 32], strides = [1, 1]} : vector<8x128xf32> to vector<8x32xf32>
    %101 = vector.extract_strided_slice %99 {offsets = [0, 32], sizes = [8, 32], strides = [1, 1]} : vector<8x128xf32> to vector<8x32xf32>
    %102 = vector.extract_strided_slice %99 {offsets = [0, 64], sizes = [8, 32], strides = [1, 1]} : vector<8x128xf32> to vector<8x32xf32>
    %103 = vector.extract_strided_slice %99 {offsets = [0, 96], sizes = [8, 32], strides = [1, 1]} : vector<8x128xf32> to vector<8x32xf32>
    %104 = arith.mulf %101, %86 : vector<8x32xf32>
    %105 = arith.mulf %100, %102 : vector<8x32xf32>
    %106 = arith.addf %104, %105 : vector<8x32xf32>
    %107 = math.tanh %106 : vector<8x32xf32>
    %108 = arith.mulf %103, %107 : vector<8x32xf32>
    %cst_21 = arith.constant dense<0.000000e+00> : vector<8x128xf32>
    %109 = tpu.matmul %108, %12, %cst_21 {dimension_numbers = #tpu.dot_dimension_numbers<[1], [0], [0], [1], [0, 0, 1, 1], [], []>} : vector<8x32xf32>, vector<32x128xf32>, vector<8x128xf32> -> vector<8x128xf32>
    %110 = arith.addf %33, %109 : vector<8x128xf32>
    %cst_22 = arith.constant 5.000000e-01 : f32
    %111 = vector.broadcast %cst_22 : f32 to vector<8x128xf32>
    %112 = arith.mulf %111, %110 : vector<8x128xf32>
    %113 = arith.select %5, %110, %112 : vector<8x128xi1>, vector<8x128xf32>
    %114 = math.tanh %113 : vector<8x128xf32>
    %cst_23 = arith.constant 5.000000e-01 : f32
    %115 = vector.broadcast %cst_23 : f32 to vector<8x128xf32>
    %116 = arith.mulf %115, %114 : vector<8x128xf32>
    %cst_24 = arith.constant 5.000000e-01 : f32
    %117 = vector.broadcast %cst_24 : f32 to vector<8x128xf32>
    %118 = arith.addf %116, %117 : vector<8x128xf32>
    %119 = arith.select %5, %114, %118 : vector<8x128xi1>, vector<8x128xf32>
    %120 = vector.extract_strided_slice %119 {offsets = [0, 0], sizes = [8, 32], strides = [1, 1]} : vector<8x128xf32> to vector<8x32xf32>
    %121 = vector.extract_strided_slice %119 {offsets = [0, 32], sizes = [8, 32], strides = [1, 1]} : vector<8x128xf32> to vector<8x32xf32>
    %122 = vector.extract_strided_slice %119 {offsets = [0, 64], sizes = [8, 32], strides = [1, 1]} : vector<8x128xf32> to vector<8x32xf32>
    %123 = vector.extract_strided_slice %119 {offsets = [0, 96], sizes = [8, 32], strides = [1, 1]} : vector<8x128xf32> to vector<8x32xf32>
    %124 = arith.mulf %121, %106 : vector<8x32xf32>
    %125 = arith.mulf %120, %122 : vector<8x32xf32>
    %126 = arith.addf %124, %125 : vector<8x32xf32>
    %127 = math.tanh %126 : vector<8x32xf32>
    %128 = arith.mulf %123, %127 : vector<8x32xf32>
    %cst_25 = arith.constant dense<0.000000e+00> : vector<8x128xf32>
    %129 = tpu.matmul %128, %12, %cst_25 {dimension_numbers = #tpu.dot_dimension_numbers<[1], [0], [0], [1], [0, 0, 1, 1], [], []>} : vector<8x32xf32>, vector<32x128xf32>, vector<8x128xf32> -> vector<8x128xf32>
    %130 = arith.addf %37, %129 : vector<8x128xf32>
    %cst_26 = arith.constant 5.000000e-01 : f32
    %131 = vector.broadcast %cst_26 : f32 to vector<8x128xf32>
    %132 = arith.mulf %131, %130 : vector<8x128xf32>
    %133 = arith.select %5, %130, %132 : vector<8x128xi1>, vector<8x128xf32>
    %134 = math.tanh %133 : vector<8x128xf32>
    %cst_27 = arith.constant 5.000000e-01 : f32
    %135 = vector.broadcast %cst_27 : f32 to vector<8x128xf32>
    %136 = arith.mulf %135, %134 : vector<8x128xf32>
    %cst_28 = arith.constant 5.000000e-01 : f32
    %137 = vector.broadcast %cst_28 : f32 to vector<8x128xf32>
    %138 = arith.addf %136, %137 : vector<8x128xf32>
    %139 = arith.select %5, %134, %138 : vector<8x128xi1>, vector<8x128xf32>
    %140 = vector.extract_strided_slice %139 {offsets = [0, 0], sizes = [8, 32], strides = [1, 1]} : vector<8x128xf32> to vector<8x32xf32>
    %141 = vector.extract_strided_slice %139 {offsets = [0, 32], sizes = [8, 32], strides = [1, 1]} : vector<8x128xf32> to vector<8x32xf32>
    %142 = vector.extract_strided_slice %139 {offsets = [0, 64], sizes = [8, 32], strides = [1, 1]} : vector<8x128xf32> to vector<8x32xf32>
    %143 = vector.extract_strided_slice %139 {offsets = [0, 96], sizes = [8, 32], strides = [1, 1]} : vector<8x128xf32> to vector<8x32xf32>
    %144 = arith.mulf %141, %126 : vector<8x32xf32>
    %145 = arith.mulf %140, %142 : vector<8x32xf32>
    %146 = arith.addf %144, %145 : vector<8x32xf32>
    %147 = math.tanh %146 : vector<8x32xf32>
    %148 = arith.mulf %143, %147 : vector<8x32xf32>
    %cst_29 = arith.constant dense<0.000000e+00> : vector<8x128xf32>
    %149 = tpu.matmul %148, %12, %cst_29 {dimension_numbers = #tpu.dot_dimension_numbers<[1], [0], [0], [1], [0, 0, 1, 1], [], []>} : vector<8x32xf32>, vector<32x128xf32>, vector<8x128xf32> -> vector<8x128xf32>
    %150 = arith.addf %41, %149 : vector<8x128xf32>
    %cst_30 = arith.constant 5.000000e-01 : f32
    %151 = vector.broadcast %cst_30 : f32 to vector<8x128xf32>
    %152 = arith.mulf %151, %150 : vector<8x128xf32>
    %153 = arith.select %5, %150, %152 : vector<8x128xi1>, vector<8x128xf32>
    %154 = math.tanh %153 : vector<8x128xf32>
    %cst_31 = arith.constant 5.000000e-01 : f32
    %155 = vector.broadcast %cst_31 : f32 to vector<8x128xf32>
    %156 = arith.mulf %155, %154 : vector<8x128xf32>
    %cst_32 = arith.constant 5.000000e-01 : f32
    %157 = vector.broadcast %cst_32 : f32 to vector<8x128xf32>
    %158 = arith.addf %156, %157 : vector<8x128xf32>
    %159 = arith.select %5, %154, %158 : vector<8x128xi1>, vector<8x128xf32>
    %160 = vector.extract_strided_slice %159 {offsets = [0, 0], sizes = [8, 32], strides = [1, 1]} : vector<8x128xf32> to vector<8x32xf32>
    %161 = vector.extract_strided_slice %159 {offsets = [0, 32], sizes = [8, 32], strides = [1, 1]} : vector<8x128xf32> to vector<8x32xf32>
    %162 = vector.extract_strided_slice %159 {offsets = [0, 64], sizes = [8, 32], strides = [1, 1]} : vector<8x128xf32> to vector<8x32xf32>
    %163 = vector.extract_strided_slice %159 {offsets = [0, 96], sizes = [8, 32], strides = [1, 1]} : vector<8x128xf32> to vector<8x32xf32>
    %164 = arith.mulf %161, %146 : vector<8x32xf32>
    %165 = arith.mulf %160, %162 : vector<8x32xf32>
    %166 = arith.addf %164, %165 : vector<8x32xf32>
    %167 = math.tanh %166 : vector<8x32xf32>
    %168 = arith.mulf %163, %167 : vector<8x32xf32>
    %cst_33 = arith.constant dense<0.000000e+00> : vector<8x128xf32>
    %169 = tpu.matmul %168, %12, %cst_33 {dimension_numbers = #tpu.dot_dimension_numbers<[1], [0], [0], [1], [0, 0, 1, 1], [], []>} : vector<8x32xf32>, vector<32x128xf32>, vector<8x128xf32> -> vector<8x128xf32>
    %170 = arith.addf %45, %169 : vector<8x128xf32>
    %cst_34 = arith.constant 5.000000e-01 : f32
    %171 = vector.broadcast %cst_34 : f32 to vector<8x128xf32>
    %172 = arith.mulf %171, %170 : vector<8x128xf32>
    %173 = arith.select %5, %170, %172 : vector<8x128xi1>, vector<8x128xf32>
    %174 = math.tanh %173 : vector<8x128xf32>
    %cst_35 = arith.constant 5.000000e-01 : f32
    %175 = vector.broadcast %cst_35 : f32 to vector<8x128xf32>
    %176 = arith.mulf %175, %174 : vector<8x128xf32>
    %cst_36 = arith.constant 5.000000e-01 : f32
    %177 = vector.broadcast %cst_36 : f32 to vector<8x128xf32>
    %178 = arith.addf %176, %177 : vector<8x128xf32>
    %179 = arith.select %5, %174, %178 : vector<8x128xi1>, vector<8x128xf32>
    %180 = vector.extract_strided_slice %179 {offsets = [0, 0], sizes = [8, 32], strides = [1, 1]} : vector<8x128xf32> to vector<8x32xf32>
    %181 = vector.extract_strided_slice %179 {offsets = [0, 32], sizes = [8, 32], strides = [1, 1]} : vector<8x128xf32> to vector<8x32xf32>
    %182 = vector.extract_strided_slice %179 {offsets = [0, 64], sizes = [8, 32], strides = [1, 1]} : vector<8x128xf32> to vector<8x32xf32>
    %183 = vector.extract_strided_slice %179 {offsets = [0, 96], sizes = [8, 32], strides = [1, 1]} : vector<8x128xf32> to vector<8x32xf32>
    %184 = arith.mulf %181, %166 : vector<8x32xf32>
    %185 = arith.mulf %180, %182 : vector<8x32xf32>
    %186 = arith.addf %184, %185 : vector<8x32xf32>
    %187 = math.tanh %186 : vector<8x32xf32>
    %188 = arith.mulf %183, %187 : vector<8x32xf32>
    %cst_37 = arith.constant dense<0.000000e+00> : vector<8x128xf32>
    %189 = tpu.matmul %188, %12, %cst_37 {dimension_numbers = #tpu.dot_dimension_numbers<[1], [0], [0], [1], [0, 0, 1, 1], [], []>} : vector<8x32xf32>, vector<32x128xf32>, vector<8x128xf32> -> vector<8x128xf32>
    %190 = arith.addf %49, %189 : vector<8x128xf32>
    %cst_38 = arith.constant 5.000000e-01 : f32
    %191 = vector.broadcast %cst_38 : f32 to vector<8x128xf32>
    %192 = arith.mulf %191, %190 : vector<8x128xf32>
    %193 = arith.select %5, %190, %192 : vector<8x128xi1>, vector<8x128xf32>
    %194 = math.tanh %193 : vector<8x128xf32>
    %cst_39 = arith.constant 5.000000e-01 : f32
    %195 = vector.broadcast %cst_39 : f32 to vector<8x128xf32>
    %196 = arith.mulf %195, %194 : vector<8x128xf32>
    %cst_40 = arith.constant 5.000000e-01 : f32
    %197 = vector.broadcast %cst_40 : f32 to vector<8x128xf32>
    %198 = arith.addf %196, %197 : vector<8x128xf32>
    %199 = arith.select %5, %194, %198 : vector<8x128xi1>, vector<8x128xf32>
    %200 = vector.extract_strided_slice %199 {offsets = [0, 0], sizes = [8, 32], strides = [1, 1]} : vector<8x128xf32> to vector<8x32xf32>
    %201 = vector.extract_strided_slice %199 {offsets = [0, 32], sizes = [8, 32], strides = [1, 1]} : vector<8x128xf32> to vector<8x32xf32>
    %202 = vector.extract_strided_slice %199 {offsets = [0, 64], sizes = [8, 32], strides = [1, 1]} : vector<8x128xf32> to vector<8x32xf32>
    %203 = vector.extract_strided_slice %199 {offsets = [0, 96], sizes = [8, 32], strides = [1, 1]} : vector<8x128xf32> to vector<8x32xf32>
    %204 = arith.mulf %201, %186 : vector<8x32xf32>
    %205 = arith.mulf %200, %202 : vector<8x32xf32>
    %206 = arith.addf %204, %205 : vector<8x32xf32>
    %207 = math.tanh %206 : vector<8x32xf32>
    %208 = arith.mulf %203, %207 : vector<8x32xf32>
    %209 = tpu.concatenate %68, %88, %108, %128, %148, %168, %188, %208 in 0 : vector<8x32xf32>, vector<8x32xf32>, vector<8x32xf32>, vector<8x32xf32>, vector<8x32xf32>, vector<8x32xf32>, vector<8x32xf32>, vector<8x32xf32> -> vector<64x32xf32>
    %c0_41 = arith.constant 0 : index
    %c0_42 = arith.constant 0 : index
    %210 = vector.load %arg6[%c0_41, %c0_42] : memref<32x128xf32, #tpu.memory_space<vmem>>, vector<32x128xf32>
    %c0_43 = arith.constant 0 : index
    %c0_44 = arith.constant 0 : index
    %211 = vector.load %arg7[%c0_43, %c0_44] : memref<32x128xf32, #tpu.memory_space<vmem>>, vector<32x128xf32>
    %c0_45 = arith.constant 0 : index
    %c0_46 = arith.constant 0 : index
    %212 = vector.load %arg8[%c0_45, %c0_46] : memref<1x128xf32, #tpu.memory_space<vmem>>, vector<1x128xf32>
    %cst_47 = arith.constant dense<0.000000e+00> : vector<64x128xf32>
    %213 = tpu.matmul %209, %210, %cst_47 {dimension_numbers = #tpu.dot_dimension_numbers<[1], [0], [0], [1], [0, 0, 1, 1], [], []>} : vector<64x32xf32>, vector<32x128xf32>, vector<64x128xf32> -> vector<64x128xf32>
    %214 = vector.broadcast %212 : vector<1x128xf32> to vector<64x128xf32>
    %215 = arith.addf %213, %214 : vector<64x128xf32>
    %216 = vector.extract_strided_slice %215 {offsets = [0, 0], sizes = [8, 128], strides = [1, 1]} : vector<64x128xf32> to vector<8x128xf32>
    %217 = vector.extract_strided_slice %215 {offsets = [8, 0], sizes = [8, 128], strides = [1, 1]} : vector<64x128xf32> to vector<8x128xf32>
    %218 = vector.extract_strided_slice %215 {offsets = [16, 0], sizes = [8, 128], strides = [1, 1]} : vector<64x128xf32> to vector<8x128xf32>
    %219 = vector.extract_strided_slice %215 {offsets = [24, 0], sizes = [8, 128], strides = [1, 1]} : vector<64x128xf32> to vector<8x128xf32>
    %220 = vector.extract_strided_slice %215 {offsets = [32, 0], sizes = [8, 128], strides = [1, 1]} : vector<64x128xf32> to vector<8x128xf32>
    %221 = vector.extract_strided_slice %215 {offsets = [40, 0], sizes = [8, 128], strides = [1, 1]} : vector<64x128xf32> to vector<8x128xf32>
    %222 = vector.extract_strided_slice %215 {offsets = [48, 0], sizes = [8, 128], strides = [1, 1]} : vector<64x128xf32> to vector<8x128xf32>
    %223 = vector.extract_strided_slice %215 {offsets = [56, 0], sizes = [8, 128], strides = [1, 1]} : vector<64x128xf32> to vector<8x128xf32>
    %cst_48 = arith.constant 0.000000e+00 : f32
    %224 = vector.broadcast %cst_48 : f32 to vector<8x32xf32>
    %cst_49 = arith.constant 0.000000e+00 : f32
    %225 = vector.broadcast %cst_49 : f32 to vector<8x32xf32>
    %cst_50 = arith.constant 5.000000e-01 : f32
    %226 = vector.broadcast %cst_50 : f32 to vector<8x128xf32>
    %227 = arith.mulf %226, %216 : vector<8x128xf32>
    %228 = arith.select %5, %216, %227 : vector<8x128xi1>, vector<8x128xf32>
    %229 = math.tanh %228 : vector<8x128xf32>
    %cst_51 = arith.constant 5.000000e-01 : f32
    %230 = vector.broadcast %cst_51 : f32 to vector<8x128xf32>
    %231 = arith.mulf %230, %229 : vector<8x128xf32>
    %cst_52 = arith.constant 5.000000e-01 : f32
    %232 = vector.broadcast %cst_52 : f32 to vector<8x128xf32>
    %233 = arith.addf %231, %232 : vector<8x128xf32>
    %234 = arith.select %5, %229, %233 : vector<8x128xi1>, vector<8x128xf32>
    %235 = vector.extract_strided_slice %234 {offsets = [0, 0], sizes = [8, 32], strides = [1, 1]} : vector<8x128xf32> to vector<8x32xf32>
    %236 = vector.extract_strided_slice %234 {offsets = [0, 32], sizes = [8, 32], strides = [1, 1]} : vector<8x128xf32> to vector<8x32xf32>
    %237 = vector.extract_strided_slice %234 {offsets = [0, 64], sizes = [8, 32], strides = [1, 1]} : vector<8x128xf32> to vector<8x32xf32>
    %238 = vector.extract_strided_slice %234 {offsets = [0, 96], sizes = [8, 32], strides = [1, 1]} : vector<8x128xf32> to vector<8x32xf32>
    %239 = arith.mulf %236, %224 : vector<8x32xf32>
    %240 = arith.mulf %235, %237 : vector<8x32xf32>
    %241 = arith.addf %239, %240 : vector<8x32xf32>
    %242 = math.tanh %241 : vector<8x32xf32>
    %243 = arith.mulf %238, %242 : vector<8x32xf32>
    %cst_53 = arith.constant 0.000000e+00 : f32
    %244 = vector.broadcast %cst_53 : f32 to vector<8x1xf32>
    %245 = arith.cmpf ogt, %6, %244 : vector<8x1xf32>
    %cst_54 = arith.constant 0.000000e+00 : f32
    %246 = vector.shape_cast %245 : vector<8x1xi1> to vector<8x1xi1>
    %247 = vector.broadcast %246 : vector<8x1xi1> to vector<8x32xi1>
    %248 = vector.broadcast %cst_54 : f32 to vector<8x32xf32>
    %249 = arith.select %247, %243, %248 : vector<8x32xi1>, vector<8x32xf32>
    %250 = arith.addf %225, %249 : vector<8x32xf32>
    %cst_55 = arith.constant dense<0.000000e+00> : vector<8x128xf32>
    %251 = tpu.matmul %243, %211, %cst_55 {dimension_numbers = #tpu.dot_dimension_numbers<[1], [0], [0], [1], [0, 0, 1, 1], [], []>} : vector<8x32xf32>, vector<32x128xf32>, vector<8x128xf32> -> vector<8x128xf32>
    %252 = arith.addf %217, %251 : vector<8x128xf32>
    %cst_56 = arith.constant 5.000000e-01 : f32
    %253 = vector.broadcast %cst_56 : f32 to vector<8x128xf32>
    %254 = arith.mulf %253, %252 : vector<8x128xf32>
    %255 = arith.select %5, %252, %254 : vector<8x128xi1>, vector<8x128xf32>
    %256 = math.tanh %255 : vector<8x128xf32>
    %cst_57 = arith.constant 5.000000e-01 : f32
    %257 = vector.broadcast %cst_57 : f32 to vector<8x128xf32>
    %258 = arith.mulf %257, %256 : vector<8x128xf32>
    %cst_58 = arith.constant 5.000000e-01 : f32
    %259 = vector.broadcast %cst_58 : f32 to vector<8x128xf32>
    %260 = arith.addf %258, %259 : vector<8x128xf32>
    %261 = arith.select %5, %256, %260 : vector<8x128xi1>, vector<8x128xf32>
    %262 = vector.extract_strided_slice %261 {offsets = [0, 0], sizes = [8, 32], strides = [1, 1]} : vector<8x128xf32> to vector<8x32xf32>
    %263 = vector.extract_strided_slice %261 {offsets = [0, 32], sizes = [8, 32], strides = [1, 1]} : vector<8x128xf32> to vector<8x32xf32>
    %264 = vector.extract_strided_slice %261 {offsets = [0, 64], sizes = [8, 32], strides = [1, 1]} : vector<8x128xf32> to vector<8x32xf32>
    %265 = vector.extract_strided_slice %261 {offsets = [0, 96], sizes = [8, 32], strides = [1, 1]} : vector<8x128xf32> to vector<8x32xf32>
    %266 = arith.mulf %263, %241 : vector<8x32xf32>
    %267 = arith.mulf %262, %264 : vector<8x32xf32>
    %268 = arith.addf %266, %267 : vector<8x32xf32>
    %269 = math.tanh %268 : vector<8x32xf32>
    %270 = arith.mulf %265, %269 : vector<8x32xf32>
    %cst_59 = arith.constant 1.000000e+00 : f32
    %271 = vector.broadcast %cst_59 : f32 to vector<8x1xf32>
    %272 = arith.cmpf ogt, %6, %271 : vector<8x1xf32>
    %cst_60 = arith.constant 0.000000e+00 : f32
    %273 = vector.shape_cast %272 : vector<8x1xi1> to vector<8x1xi1>
    %274 = vector.broadcast %273 : vector<8x1xi1> to vector<8x32xi1>
    %275 = vector.broadcast %cst_60 : f32 to vector<8x32xf32>
    %276 = arith.select %274, %270, %275 : vector<8x32xi1>, vector<8x32xf32>
    %277 = arith.addf %250, %276 : vector<8x32xf32>
    %cst_61 = arith.constant dense<0.000000e+00> : vector<8x128xf32>
    %278 = tpu.matmul %270, %211, %cst_61 {dimension_numbers = #tpu.dot_dimension_numbers<[1], [0], [0], [1], [0, 0, 1, 1], [], []>} : vector<8x32xf32>, vector<32x128xf32>, vector<8x128xf32> -> vector<8x128xf32>
    %279 = arith.addf %218, %278 : vector<8x128xf32>
    %cst_62 = arith.constant 5.000000e-01 : f32
    %280 = vector.broadcast %cst_62 : f32 to vector<8x128xf32>
    %281 = arith.mulf %280, %279 : vector<8x128xf32>
    %282 = arith.select %5, %279, %281 : vector<8x128xi1>, vector<8x128xf32>
    %283 = math.tanh %282 : vector<8x128xf32>
    %cst_63 = arith.constant 5.000000e-01 : f32
    %284 = vector.broadcast %cst_63 : f32 to vector<8x128xf32>
    %285 = arith.mulf %284, %283 : vector<8x128xf32>
    %cst_64 = arith.constant 5.000000e-01 : f32
    %286 = vector.broadcast %cst_64 : f32 to vector<8x128xf32>
    %287 = arith.addf %285, %286 : vector<8x128xf32>
    %288 = arith.select %5, %283, %287 : vector<8x128xi1>, vector<8x128xf32>
    %289 = vector.extract_strided_slice %288 {offsets = [0, 0], sizes = [8, 32], strides = [1, 1]} : vector<8x128xf32> to vector<8x32xf32>
    %290 = vector.extract_strided_slice %288 {offsets = [0, 32], sizes = [8, 32], strides = [1, 1]} : vector<8x128xf32> to vector<8x32xf32>
    %291 = vector.extract_strided_slice %288 {offsets = [0, 64], sizes = [8, 32], strides = [1, 1]} : vector<8x128xf32> to vector<8x32xf32>
    %292 = vector.extract_strided_slice %288 {offsets = [0, 96], sizes = [8, 32], strides = [1, 1]} : vector<8x128xf32> to vector<8x32xf32>
    %293 = arith.mulf %290, %268 : vector<8x32xf32>
    %294 = arith.mulf %289, %291 : vector<8x32xf32>
    %295 = arith.addf %293, %294 : vector<8x32xf32>
    %296 = math.tanh %295 : vector<8x32xf32>
    %297 = arith.mulf %292, %296 : vector<8x32xf32>
    %cst_65 = arith.constant 2.000000e+00 : f32
    %298 = vector.broadcast %cst_65 : f32 to vector<8x1xf32>
    %299 = arith.cmpf ogt, %6, %298 : vector<8x1xf32>
    %cst_66 = arith.constant 0.000000e+00 : f32
    %300 = vector.shape_cast %299 : vector<8x1xi1> to vector<8x1xi1>
    %301 = vector.broadcast %300 : vector<8x1xi1> to vector<8x32xi1>
    %302 = vector.broadcast %cst_66 : f32 to vector<8x32xf32>
    %303 = arith.select %301, %297, %302 : vector<8x32xi1>, vector<8x32xf32>
    %304 = arith.addf %277, %303 : vector<8x32xf32>
    %cst_67 = arith.constant dense<0.000000e+00> : vector<8x128xf32>
    %305 = tpu.matmul %297, %211, %cst_67 {dimension_numbers = #tpu.dot_dimension_numbers<[1], [0], [0], [1], [0, 0, 1, 1], [], []>} : vector<8x32xf32>, vector<32x128xf32>, vector<8x128xf32> -> vector<8x128xf32>
    %306 = arith.addf %219, %305 : vector<8x128xf32>
    %cst_68 = arith.constant 5.000000e-01 : f32
    %307 = vector.broadcast %cst_68 : f32 to vector<8x128xf32>
    %308 = arith.mulf %307, %306 : vector<8x128xf32>
    %309 = arith.select %5, %306, %308 : vector<8x128xi1>, vector<8x128xf32>
    %310 = math.tanh %309 : vector<8x128xf32>
    %cst_69 = arith.constant 5.000000e-01 : f32
    %311 = vector.broadcast %cst_69 : f32 to vector<8x128xf32>
    %312 = arith.mulf %311, %310 : vector<8x128xf32>
    %cst_70 = arith.constant 5.000000e-01 : f32
    %313 = vector.broadcast %cst_70 : f32 to vector<8x128xf32>
    %314 = arith.addf %312, %313 : vector<8x128xf32>
    %315 = arith.select %5, %310, %314 : vector<8x128xi1>, vector<8x128xf32>
    %316 = vector.extract_strided_slice %315 {offsets = [0, 0], sizes = [8, 32], strides = [1, 1]} : vector<8x128xf32> to vector<8x32xf32>
    %317 = vector.extract_strided_slice %315 {offsets = [0, 32], sizes = [8, 32], strides = [1, 1]} : vector<8x128xf32> to vector<8x32xf32>
    %318 = vector.extract_strided_slice %315 {offsets = [0, 64], sizes = [8, 32], strides = [1, 1]} : vector<8x128xf32> to vector<8x32xf32>
    %319 = vector.extract_strided_slice %315 {offsets = [0, 96], sizes = [8, 32], strides = [1, 1]} : vector<8x128xf32> to vector<8x32xf32>
    %320 = arith.mulf %317, %295 : vector<8x32xf32>
    %321 = arith.mulf %316, %318 : vector<8x32xf32>
    %322 = arith.addf %320, %321 : vector<8x32xf32>
    %323 = math.tanh %322 : vector<8x32xf32>
    %324 = arith.mulf %319, %323 : vector<8x32xf32>
    %cst_71 = arith.constant 3.000000e+00 : f32
    %325 = vector.broadcast %cst_71 : f32 to vector<8x1xf32>
    %326 = arith.cmpf ogt, %6, %325 : vector<8x1xf32>
    %cst_72 = arith.constant 0.000000e+00 : f32
    %327 = vector.shape_cast %326 : vector<8x1xi1> to vector<8x1xi1>
    %328 = vector.broadcast %327 : vector<8x1xi1> to vector<8x32xi1>
    %329 = vector.broadcast %cst_72 : f32 to vector<8x32xf32>
    %330 = arith.select %328, %324, %329 : vector<8x32xi1>, vector<8x32xf32>
    %331 = arith.addf %304, %330 : vector<8x32xf32>
    %cst_73 = arith.constant dense<0.000000e+00> : vector<8x128xf32>
    %332 = tpu.matmul %324, %211, %cst_73 {dimension_numbers = #tpu.dot_dimension_numbers<[1], [0], [0], [1], [0, 0, 1, 1], [], []>} : vector<8x32xf32>, vector<32x128xf32>, vector<8x128xf32> -> vector<8x128xf32>
    %333 = arith.addf %220, %332 : vector<8x128xf32>
    %cst_74 = arith.constant 5.000000e-01 : f32
    %334 = vector.broadcast %cst_74 : f32 to vector<8x128xf32>
    %335 = arith.mulf %334, %333 : vector<8x128xf32>
    %336 = arith.select %5, %333, %335 : vector<8x128xi1>, vector<8x128xf32>
    %337 = math.tanh %336 : vector<8x128xf32>
    %cst_75 = arith.constant 5.000000e-01 : f32
    %338 = vector.broadcast %cst_75 : f32 to vector<8x128xf32>
    %339 = arith.mulf %338, %337 : vector<8x128xf32>
    %cst_76 = arith.constant 5.000000e-01 : f32
    %340 = vector.broadcast %cst_76 : f32 to vector<8x128xf32>
    %341 = arith.addf %339, %340 : vector<8x128xf32>
    %342 = arith.select %5, %337, %341 : vector<8x128xi1>, vector<8x128xf32>
    %343 = vector.extract_strided_slice %342 {offsets = [0, 0], sizes = [8, 32], strides = [1, 1]} : vector<8x128xf32> to vector<8x32xf32>
    %344 = vector.extract_strided_slice %342 {offsets = [0, 32], sizes = [8, 32], strides = [1, 1]} : vector<8x128xf32> to vector<8x32xf32>
    %345 = vector.extract_strided_slice %342 {offsets = [0, 64], sizes = [8, 32], strides = [1, 1]} : vector<8x128xf32> to vector<8x32xf32>
    %346 = vector.extract_strided_slice %342 {offsets = [0, 96], sizes = [8, 32], strides = [1, 1]} : vector<8x128xf32> to vector<8x32xf32>
    %347 = arith.mulf %344, %322 : vector<8x32xf32>
    %348 = arith.mulf %343, %345 : vector<8x32xf32>
    %349 = arith.addf %347, %348 : vector<8x32xf32>
    %350 = math.tanh %349 : vector<8x32xf32>
    %351 = arith.mulf %346, %350 : vector<8x32xf32>
    %cst_77 = arith.constant 4.000000e+00 : f32
    %352 = vector.broadcast %cst_77 : f32 to vector<8x1xf32>
    %353 = arith.cmpf ogt, %6, %352 : vector<8x1xf32>
    %cst_78 = arith.constant 0.000000e+00 : f32
    %354 = vector.shape_cast %353 : vector<8x1xi1> to vector<8x1xi1>
    %355 = vector.broadcast %354 : vector<8x1xi1> to vector<8x32xi1>
    %356 = vector.broadcast %cst_78 : f32 to vector<8x32xf32>
    %357 = arith.select %355, %351, %356 : vector<8x32xi1>, vector<8x32xf32>
    %358 = arith.addf %331, %357 : vector<8x32xf32>
    %cst_79 = arith.constant dense<0.000000e+00> : vector<8x128xf32>
    %359 = tpu.matmul %351, %211, %cst_79 {dimension_numbers = #tpu.dot_dimension_numbers<[1], [0], [0], [1], [0, 0, 1, 1], [], []>} : vector<8x32xf32>, vector<32x128xf32>, vector<8x128xf32> -> vector<8x128xf32>
    %360 = arith.addf %221, %359 : vector<8x128xf32>
    %cst_80 = arith.constant 5.000000e-01 : f32
    %361 = vector.broadcast %cst_80 : f32 to vector<8x128xf32>
    %362 = arith.mulf %361, %360 : vector<8x128xf32>
    %363 = arith.select %5, %360, %362 : vector<8x128xi1>, vector<8x128xf32>
    %364 = math.tanh %363 : vector<8x128xf32>
    %cst_81 = arith.constant 5.000000e-01 : f32
    %365 = vector.broadcast %cst_81 : f32 to vector<8x128xf32>
    %366 = arith.mulf %365, %364 : vector<8x128xf32>
    %cst_82 = arith.constant 5.000000e-01 : f32
    %367 = vector.broadcast %cst_82 : f32 to vector<8x128xf32>
    %368 = arith.addf %366, %367 : vector<8x128xf32>
    %369 = arith.select %5, %364, %368 : vector<8x128xi1>, vector<8x128xf32>
    %370 = vector.extract_strided_slice %369 {offsets = [0, 0], sizes = [8, 32], strides = [1, 1]} : vector<8x128xf32> to vector<8x32xf32>
    %371 = vector.extract_strided_slice %369 {offsets = [0, 32], sizes = [8, 32], strides = [1, 1]} : vector<8x128xf32> to vector<8x32xf32>
    %372 = vector.extract_strided_slice %369 {offsets = [0, 64], sizes = [8, 32], strides = [1, 1]} : vector<8x128xf32> to vector<8x32xf32>
    %373 = vector.extract_strided_slice %369 {offsets = [0, 96], sizes = [8, 32], strides = [1, 1]} : vector<8x128xf32> to vector<8x32xf32>
    %374 = arith.mulf %371, %349 : vector<8x32xf32>
    %375 = arith.mulf %370, %372 : vector<8x32xf32>
    %376 = arith.addf %374, %375 : vector<8x32xf32>
    %377 = math.tanh %376 : vector<8x32xf32>
    %378 = arith.mulf %373, %377 : vector<8x32xf32>
    %cst_83 = arith.constant 5.000000e+00 : f32
    %379 = vector.broadcast %cst_83 : f32 to vector<8x1xf32>
    %380 = arith.cmpf ogt, %6, %379 : vector<8x1xf32>
    %cst_84 = arith.constant 0.000000e+00 : f32
    %381 = vector.shape_cast %380 : vector<8x1xi1> to vector<8x1xi1>
    %382 = vector.broadcast %381 : vector<8x1xi1> to vector<8x32xi1>
    %383 = vector.broadcast %cst_84 : f32 to vector<8x32xf32>
    %384 = arith.select %382, %378, %383 : vector<8x32xi1>, vector<8x32xf32>
    %385 = arith.addf %358, %384 : vector<8x32xf32>
    %cst_85 = arith.constant dense<0.000000e+00> : vector<8x128xf32>
    %386 = tpu.matmul %378, %211, %cst_85 {dimension_numbers = #tpu.dot_dimension_numbers<[1], [0], [0], [1], [0, 0, 1, 1], [], []>} : vector<8x32xf32>, vector<32x128xf32>, vector<8x128xf32> -> vector<8x128xf32>
    %387 = arith.addf %222, %386 : vector<8x128xf32>
    %cst_86 = arith.constant 5.000000e-01 : f32
    %388 = vector.broadcast %cst_86 : f32 to vector<8x128xf32>
    %389 = arith.mulf %388, %387 : vector<8x128xf32>
    %390 = arith.select %5, %387, %389 : vector<8x128xi1>, vector<8x128xf32>
    %391 = math.tanh %390 : vector<8x128xf32>
    %cst_87 = arith.constant 5.000000e-01 : f32
    %392 = vector.broadcast %cst_87 : f32 to vector<8x128xf32>
    %393 = arith.mulf %392, %391 : vector<8x128xf32>
    %cst_88 = arith.constant 5.000000e-01 : f32
    %394 = vector.broadcast %cst_88 : f32 to vector<8x128xf32>
    %395 = arith.addf %393, %394 : vector<8x128xf32>
    %396 = arith.select %5, %391, %395 : vector<8x128xi1>, vector<8x128xf32>
    %397 = vector.extract_strided_slice %396 {offsets = [0, 0], sizes = [8, 32], strides = [1, 1]} : vector<8x128xf32> to vector<8x32xf32>
    %398 = vector.extract_strided_slice %396 {offsets = [0, 32], sizes = [8, 32], strides = [1, 1]} : vector<8x128xf32> to vector<8x32xf32>
    %399 = vector.extract_strided_slice %396 {offsets = [0, 64], sizes = [8, 32], strides = [1, 1]} : vector<8x128xf32> to vector<8x32xf32>
    %400 = vector.extract_strided_slice %396 {offsets = [0, 96], sizes = [8, 32], strides = [1, 1]} : vector<8x128xf32> to vector<8x32xf32>
    %401 = arith.mulf %398, %376 : vector<8x32xf32>
    %402 = arith.mulf %397, %399 : vector<8x32xf32>
    %403 = arith.addf %401, %402 : vector<8x32xf32>
    %404 = math.tanh %403 : vector<8x32xf32>
    %405 = arith.mulf %400, %404 : vector<8x32xf32>
    %cst_89 = arith.constant 6.000000e+00 : f32
    %406 = vector.broadcast %cst_89 : f32 to vector<8x1xf32>
    %407 = arith.cmpf ogt, %6, %406 : vector<8x1xf32>
    %cst_90 = arith.constant 0.000000e+00 : f32
    %408 = vector.shape_cast %407 : vector<8x1xi1> to vector<8x1xi1>
    %409 = vector.broadcast %408 : vector<8x1xi1> to vector<8x32xi1>
    %410 = vector.broadcast %cst_90 : f32 to vector<8x32xf32>
    %411 = arith.select %409, %405, %410 : vector<8x32xi1>, vector<8x32xf32>
    %412 = arith.addf %385, %411 : vector<8x32xf32>
    %cst_91 = arith.constant dense<0.000000e+00> : vector<8x128xf32>
    %413 = tpu.matmul %405, %211, %cst_91 {dimension_numbers = #tpu.dot_dimension_numbers<[1], [0], [0], [1], [0, 0, 1, 1], [], []>} : vector<8x32xf32>, vector<32x128xf32>, vector<8x128xf32> -> vector<8x128xf32>
    %414 = arith.addf %223, %413 : vector<8x128xf32>
    %cst_92 = arith.constant 5.000000e-01 : f32
    %415 = vector.broadcast %cst_92 : f32 to vector<8x128xf32>
    %416 = arith.mulf %415, %414 : vector<8x128xf32>
    %417 = arith.select %5, %414, %416 : vector<8x128xi1>, vector<8x128xf32>
    %418 = math.tanh %417 : vector<8x128xf32>
    %cst_93 = arith.constant 5.000000e-01 : f32
    %419 = vector.broadcast %cst_93 : f32 to vector<8x128xf32>
    %420 = arith.mulf %419, %418 : vector<8x128xf32>
    %cst_94 = arith.constant 5.000000e-01 : f32
    %421 = vector.broadcast %cst_94 : f32 to vector<8x128xf32>
    %422 = arith.addf %420, %421 : vector<8x128xf32>
    %423 = arith.select %5, %418, %422 : vector<8x128xi1>, vector<8x128xf32>
    %424 = vector.extract_strided_slice %423 {offsets = [0, 0], sizes = [8, 32], strides = [1, 1]} : vector<8x128xf32> to vector<8x32xf32>
    %425 = vector.extract_strided_slice %423 {offsets = [0, 32], sizes = [8, 32], strides = [1, 1]} : vector<8x128xf32> to vector<8x32xf32>
    %426 = vector.extract_strided_slice %423 {offsets = [0, 64], sizes = [8, 32], strides = [1, 1]} : vector<8x128xf32> to vector<8x32xf32>
    %427 = vector.extract_strided_slice %423 {offsets = [0, 96], sizes = [8, 32], strides = [1, 1]} : vector<8x128xf32> to vector<8x32xf32>
    %428 = arith.mulf %425, %403 : vector<8x32xf32>
    %429 = arith.mulf %424, %426 : vector<8x32xf32>
    %430 = arith.addf %428, %429 : vector<8x32xf32>
    %431 = math.tanh %430 : vector<8x32xf32>
    %432 = arith.mulf %427, %431 : vector<8x32xf32>
    %cst_95 = arith.constant 7.000000e+00 : f32
    %433 = vector.broadcast %cst_95 : f32 to vector<8x1xf32>
    %434 = arith.cmpf ogt, %6, %433 : vector<8x1xf32>
    %cst_96 = arith.constant 0.000000e+00 : f32
    %435 = vector.shape_cast %434 : vector<8x1xi1> to vector<8x1xi1>
    %436 = vector.broadcast %435 : vector<8x1xi1> to vector<8x32xi1>
    %437 = vector.broadcast %cst_96 : f32 to vector<8x32xf32>
    %438 = arith.select %436, %432, %437 : vector<8x32xi1>, vector<8x32xf32>
    %439 = arith.addf %412, %438 : vector<8x32xf32>
    %440 = vector.broadcast %9 : vector<8x1xf32> to vector<8x32xf32>
    %441 = arith.mulf %439, %440 : vector<8x32xf32>
    %c0_97 = arith.constant 0 : index
    %c0_98 = arith.constant 0 : index
    %442 = vector.load %arg9[%c0_97, %c0_98] : memref<32x5xf32, #tpu.memory_space<vmem>>, vector<32x5xf32>
    %cst_99 = arith.constant dense<0.000000e+00> : vector<8x5xf32>
    %443 = tpu.matmul %441, %442, %cst_99 {dimension_numbers = #tpu.dot_dimension_numbers<[1], [0], [0], [1], [0, 0, 1, 1], [], []>} : vector<8x32xf32>, vector<32x5xf32>, vector<8x5xf32> -> vector<8x5xf32>
    %c0_100 = arith.constant 0 : index
    %c0_101 = arith.constant 0 : index
    %444 = vector.load %arg10[%c0_100, %c0_101] : memref<1x5xf32, #tpu.memory_space<vmem>>, vector<1x5xf32>
    %445 = vector.broadcast %444 : vector<1x5xf32> to vector<8x5xf32>
    %446 = arith.addf %443, %445 : vector<8x5xf32>
    %c0_102 = arith.constant 0 : index
    %c0_103 = arith.constant 0 : index
    %447 = vector.load %arg11[%c0_102, %c0_103] : memref<8x5xf32, #tpu.memory_space<vmem>>, vector<8x5xf32>
    tpu.vector_store %arg11[%c0_102, %c0_103], %446 {strides = array<i32>} : memref<8x5xf32, #tpu.memory_space<vmem>>, vector<8x5xf32>,
    return
  }
  func.func @transform_0(%arg0: i32) -> (i32, i32) {
    %c0_i32 = arith.constant 0 : i32
    %c0_i32_0 = arith.constant 0 : i32
    return %arg0, %c0_i32 : i32, i32
  }
  func.func @transform_1(%arg0: i32) -> (i32, i32) {
    %c0_i32 = arith.constant 0 : i32
    %c0_i32_0 = arith.constant 0 : i32
    return %arg0, %c0_i32 : i32, i32
  }
  func.func @transform_2(%arg0: i32) -> (i32, i32) {
    %c0_i32 = arith.constant 0 : i32
    %c0_i32_0 = arith.constant 0 : i32
    %c0_i32_1 = arith.constant 0 : i32
    return %c0_i32, %c0_i32_0 : i32, i32
  }
  func.func @transform_3(%arg0: i32) -> (i32, i32) {
    %c0_i32 = arith.constant 0 : i32
    %c0_i32_0 = arith.constant 0 : i32
    %c0_i32_1 = arith.constant 0 : i32
    return %c0_i32, %c0_i32_0 : i32, i32
  }
  func.func @transform_4(%arg0: i32) -> (i32, i32) {
    %c0_i32 = arith.constant 0 : i32
    %c0_i32_0 = arith.constant 0 : i32
    %c0_i32_1 = arith.constant 0 : i32
    return %c0_i32, %c0_i32_0 : i32, i32
  }
  func.func @transform_5(%arg0: i32) -> (i32, i32) {
    %c0_i32 = arith.constant 0 : i32
    %c0_i32_0 = arith.constant 0 : i32
    %c0_i32_1 = arith.constant 0 : i32
    return %c0_i32, %c0_i32_0 : i32, i32
  }
  func.func @transform_6(%arg0: i32) -> (i32, i32) {
    %c0_i32 = arith.constant 0 : i32
    %c0_i32_0 = arith.constant 0 : i32
    %c0_i32_1 = arith.constant 0 : i32
    return %c0_i32, %c0_i32_0 : i32, i32
  }
  func.func @transform_7(%arg0: i32) -> (i32, i32) {
    %c0_i32 = arith.constant 0 : i32
    %c0_i32_0 = arith.constant 0 : i32
    %c0_i32_1 = arith.constant 0 : i32
    return %c0_i32, %c0_i32_0 : i32, i32
  }
  func.func @transform_8(%arg0: i32) -> (i32, i32) {
    %c0_i32 = arith.constant 0 : i32
    %c0_i32_0 = arith.constant 0 : i32
    %c0_i32_1 = arith.constant 0 : i32
    return %c0_i32, %c0_i32_0 : i32, i32
  }
  func.func @transform_9(%arg0: i32) -> (i32, i32) {
    %c0_i32 = arith.constant 0 : i32
    %c0_i32_0 = arith.constant 0 : i32
    %c0_i32_1 = arith.constant 0 : i32
    return %c0_i32, %c0_i32_0 : i32, i32
  }
  func.func @transform_10(%arg0: i32) -> (i32, i32) {
    %c0_i32 = arith.constant 0 : i32
    %c0_i32_0 = arith.constant 0 : i32
    return %arg0, %c0_i32 : i32, i32
  }
}

</mosaic_0001>

<bundles_post_ra>
// kernel: tpu_custom_call.1
= control target key start
LH: loop header
LB: loop body
LE: loop exit
PB: predicated region body
PF: predicated region fallthrough
CT: control target
= control target key end

     0   :  { %15 = vsyncpa [#allocation3], 0  ;;  %s2903_s0 = inlined_call_operand.vmem [shape: f32[8,8], index: 0, kind: input, shape index: {}]   ;;  %s2904_s1 = inlined_call_operand.vmem [shape: f32[8,1], index: 1, kind: input, shape index: {}]   ;;  %s2905_s2 = inlined_call_operand.vmem [shape: f32[1,128], index: 2, kind: input, shape index: {}]   ;;  %s2906_s3 = inlined_call_operand.vmem [shape: f32[32,128], index: 3, kind: input, shape index: {}]   ;;  %s2907_s4 = inlined_call_operand.vmem [shape: f32[1,128], index: 4, kind: input, shape index: {}]   ;;  %s2908_s5 = inlined_call_operand.hbm [shape: f32[32,128], index: 5, kind: input, shape index: {}]   ;;  %s2909_s6 = inlined_call_operand.hbm [shape: f32[32,128], index: 6, kind: input, shape index: {}]   ;;  %s2910_s7 = inlined_call_operand.vmem [shape: f32[1,128], index: 7, kind: input, shape index: {}]   ;;  %s2911_s8 = inlined_call_operand.vmem [shape: f32[32,5], index: 8, kind: input, shape index: {}]   ;;  %s2912_s9 = inlined_call_operand.vmem [shape: f32[1,5], index: 9, kind: input, shape index: {}]   ;;  %s2913_s10 = inlined_call_operand.hbm [shape: f32[8,5], index: 10, kind: output, shape index: {}]  }
   0x1   :  { %16 = vsyncpa [#allocation6], 0 }
   0x2   :  { %17 = vsyncpa [#allocation4], 0  ;;  %s2330_s13 = smov [#allocation2]  }
   0x3   :  { %s33_s14 = sshll.u32 %s2330_s13, 4  ;;  %s34_s14 = int_to_ptr.vmem [resolvable:$true] %s33_s14 }
   0x4   :  { %s2272_s15 = scalar_lea.vmem %s34_s14, 512  ;;  %p2277_p1 = scmp.lt.s32.totalorder %s34_s14, %s34_s14 }
   0x5   :  { %p2273_p0 = scmp.ne.s32.totalorder %s34_s14, %s2272_s15  ;;  %p2278_p2 = scmp.lt.s32.totalorder %s2272_s15, %s2272_s15 }
   0x7   :  { %p2279_p3 = por %p2278_p2, %p2277_p1 }
   0x9   :  { %p2280_p4 = pnand %p2279_p3, %p2273_p0 }
   0xb   :  { %2283 = shalt.err (!%p2280_p4)
}
   0xc   :  { %s2331_s16 = smov 128   ;;  %s2332_s17 = smov 8  }
   0xd   :  { %39 = dma.hbm_to_vmem [thread:$0]  %s2908_s5, 512, %s34_s14, [#allocation3], %s2331_s16, %s2331_s16, %s2332_s17  }
   0xe   :  { %s2333_s20 = smov [#allocation5]  }
   0xf   :  { %s45_s21 = sshll.u32 %s2333_s20, 4  ;;  %s46_s21 = int_to_ptr.vmem [resolvable:$true] %s45_s21 }
  0x10   :  { %s2292_s22 = scalar_lea.vmem %s46_s21, 512  ;;  %p2297_p6 = scmp.lt.s32.totalorder %s46_s21, %s46_s21 }
  0x11   :  { %p2293_p5 = scmp.ne.s32.totalorder %s46_s21, %s2292_s22  ;;  %p2298_p7 = scmp.lt.s32.totalorder %s2292_s22, %s2292_s22 }
  0x13   :  { %p2299_p8 = por %p2298_p7, %p2297_p6 }
  0x15   :  { %p2300_p9 = pnand %p2299_p8, %p2293_p5 }
  0x17   :  { %2303 = shalt.err (!%p2300_p9)
}
  0x18   :  { %51 = dma.hbm_to_vmem [thread:$0]  %s2909_s6, 512, %s46_s21, [#allocation6], %s2331_s16, %s2331_s16, %s2332_s17  }
  0x19   :  { %2324 = dma.done.wait [#allocation3], 512  }
  0x1a   :  { %2325 = vsyncadd [#allocation3], 4294966784 }
  0x1b   :  { %2326 = dma.done.wait [#allocation6], 512  }
  0x1c   :  { %2327 = vsyncadd [#allocation6], 4294966784  ;;  %v2334_v0 = vmov 0   ;;  %v2412_v1 = vld [vmem:[%s2903_s0] sm:$0xff]  ;;  %v64_v2 = vlaneseq  ;;  %s2335_s0 = smov 64   ;;  %v2443_v21 = vld [vmem:[%s2906_s3 + $0x18] sm:$0xff] }
  0x1d   :  { %2188 = vset.pattern.permute.xlu0 %v2334_v0  ;;  %v2418_v4 = vld [vmem:[%s2905_s2] ss:$0 sm:$0xff]  ;;  %s2336_s2 = smov 32   ;;  %v2337_v22 = vmov 0.0   ;;  %v2449_v23 = vld [vmem:[%s2906_s3 + $0x10] sm:$0xff]  ;;  %vm2338_vm3 = vmmov 0  }
  0x1e   :  { %93 = vperm.xlu0 %2188, %v2412_v1   ;;  %v65_v3 = vand.u32 127, %v64_v2  ;;  %v2423_v5 = vld [vmem:[%s2907_s4] ss:$0 sm:$0xff]  ;;  %1986 = vmatprep.subr.mxu0 %v2337_v22  ;;  %v2459_v24 = vld [vmem:[%s2906_s3 + $0x8] sm:$0xff]  ;;  %v2339_v27 = vmov 1   ;;  %vm166_vm4 = vcmask 261120  }
  0x1f   :  { %1994 = vmatprep.mubr.msk.f32.mxu0 %vm2338_vm3, %v2337_v22  ;;  %1987 = vmatpush3.msra.mxu0 %v2443_v21  ;;  %v2468_v25 = vld [vmem:[%s2906_s3] sm:$0xff]  ;;  %v2340_v49 = vmov 2   ;;  %s2346_s25 = smov [#allocation7]  }
  0x20   :  { %vm66_vm0 = vcmp.ge.s32.totalorder %v65_v3, 64  ;;  %vm67_vm1 = vcmp.lt.s32.totalorder %v65_v3, 96  ;;  %1997 = vmatprep.subr.mxu1 %v2337_v22  ;;  %1988 = vmatprep.subr.mxu0 %v2337_v22  ;;  %s1862_s26 = sshll.u32 %s2346_s25, 4  ;;  %s1863_s26 = int_to_ptr.vmem [resolvable:$true] %s1862_s26 }
  0x21   :  { %vm2427_vm2 = vmand %vm66_vm0, %vm67_vm1  ;;  %1998 = vmatpush3.msra.mxu1 %v2443_v21  ;;  %1989 = vmatpush3.msra.mxu0 %v2449_v23  ;;  %s2304_s27 = scalar_lea.vmem %s1863_s26, 128  ;;  %p2309_p11 = scmp.lt.s32.totalorder %s1863_s26, %s1863_s26 }
  0x22   :  { %1999 = vmatprep.subr.mxu1 %v2337_v22  ;;  %1990 = vmatprep.subr.mxu0 %v2337_v22  ;;  %p2305_p10 = scmp.ne.s32.totalorder %s1863_s26, %s2304_s27  ;;  %p2310_p12 = scmp.lt.s32.totalorder %s2304_s27, %s2304_s27 }
  0x23   :  { %2000 = vmatpush3.msra.mxu1 %v2449_v23  ;;  %1991 = vmatpush3.msra.mxu0 %v2459_v24 }
  0x24   :  { %2001 = vmatprep.subr.mxu1 %v2337_v22  ;;  %1992 = vmatprep.subr.mxu0 %v2337_v22  ;;  %p2311_p13 = por %p2310_p12, %p2309_p11 }
  0x25   :  { %2002 = vmatpush3.msra.mxu1 %v2459_v24  ;;  %1993 = vmatpush3.msra.mxu0 %v2468_v25 }
  0x26   :  { %2003 = vmatprep.subr.mxu1 %v2337_v22  ;;  %2005 = vmatprep.mubr.msk.f32.mxu1 %vm2338_vm3, %v2337_v22  ;;  %p2312_p0 = pnand %p2311_p13, %p2305_p10 }
  0x27   :  { %2004 = vmatpush3.msra.mxu1 %v2468_v25  ;;  %2008 = vmatprep.subr.mxu0 %v2337_v22 }
  0x28   :  { %2019 = vmatprep.subr.mxu1 %v2337_v22  ;;  %2189 = vset.pattern.permute.xlu1 %v2339_v27 }
  0x29   :  { %2190 = vset.pattern.permute.xlu0 %v2340_v49 }
  0x99   :  { %v94_v6 = vpop.permute.xlu0 %93 }
  0x9a   :  { %v96_v7 = vmul.f32 %v2418_v4, %v94_v6 }
  0x9c   :  { %v97_v8 = vadd.f32 %v2423_v5, %v96_v7 }
  0x9e   :  { %v140_v10 = vmul.f32 0.5, %v97_v8 }
  0xa0   :  { %v141_v11 = vsel %vm2427_vm2, %v97_v8, %v140_v10 }
  0xa1   :  { %2198 = vtanh.f32 %v141_v11 }
  0xae   :  { %v2199_v12 = vpop.eup %2198 }
  0xaf   :  { %v143_v13 = vmul.f32 0.5, %v2199_v12 }
  0xb1   :  { %v144_v14 = vadd.f32 0.5, %v143_v13 }
  0xb3   :  { %v145_v15 = vsel %vm2427_vm2, %v2199_v12, %v144_v14  ;;  %v2341_v12 = vmov 3  }
  0xb4   :  { %148 = vrot.lane.b32.xlu0 %v145_v15, %s2335_s0  ;;  %v146_v18 = vmul.f32 0.0, %v145_v15 }
 0x126   :  { %v149_v16 = vpop.permute.xlu0 %148 }
 0x127   :  { %v151_v17 = vmul.f32 %v149_v16, %v145_v15 }
 0x129   :  { %153 = vrot.lane.b32.xlu1 %v151_v17, %s2336_s2 }
 0x19b   :  { %v154_v19 = vpop.permute.xlu1 %153 }
 0x19c   :  { %v2437_v20 = vadd.f32 %v154_v19, %v146_v18 }
 0x19e   :  { %2200 = vtanh.f32 %v2437_v20 }
 0x1ab   :  { %v2201_v26 = vpop.eup %2200 }
 0x1ac   :  { %159 = vrot.lane.b32.xlu1 %v2201_v26, %s2335_s0 }
 0x1b0   :  { %99 = vperm.xlu1 %2189, %v2412_v1  }
 0x1b4   :  { %2197 = vset.pattern.permute.xlu1 %v2334_v0 }
 0x21e   :  { %v160_v28 = vpop.permute.xlu1 %159 }
 0x21f   :  { %v162_v29 = vmul.f32 %v160_v28, %v145_v15 }
 0x221   :  { %164 = vrot.lane.b32.xlu0 %v162_v29, %s2336_s2 }
 0x22b   :  { %v100_v31 = vpop.permute.xlu1 %99 }
 0x22c   :  { %v102_v32 = vmul.f32 %v2418_v4, %v100_v31 }
 0x22e   :  { %v103_v33 = vadd.f32 %v2423_v5, %v102_v32 }
 0x293   :  { %v2486_v30 = vpop.permute.xlu0 %164 }
 0x294   :  { %1995 = vmatmul.mubr.msk.f32.vlgmr.msra.gmra.mxu0 %vm166_vm4, %v2486_v30 }
 0x295   :  { %2009 = vmatpush3.msra.mxu0 %v2443_v21  ;;  %2016 = vmatprep.mubr.msk.f32.mxu0 %vm2338_vm3, %v2337_v22 }
 0x296   :  { %2010 = vmatprep.subr.mxu0 %v2337_v22 }
 0x297   :  { %2011 = vmatpush3.msra.mxu0 %v2449_v23 }
 0x298   :  { %2012 = vmatprep.subr.mxu0 %v2337_v22 }
 0x299   :  { %2013 = vmatpush3.msra.mxu0 %v2459_v24 }
 0x29a   :  { %2014 = vmatprep.subr.mxu0 %v2337_v22 }
 0x29b   :  { %2015 = vmatpush3.msra.mxu0 %v2468_v25 }
 0x29c   :  { %2030 = vmatprep.subr.mxu0 %v2337_v22 }
 0x354   :  { %v235_v34 = vpop.f32.mrf.mxu0 }
 0x355   :  { %v239_v35 = vadd.f32 %v235_v34, %v103_v33 }
 0x356   :  { %v1996_v36 = vpop.f32.mrf.mxu0 }
 0x357   :  { %v240_v37 = vmul.f32 0.5, %v239_v35 }
 0x359   :  { %v241_v38 = vsel %vm2427_vm2, %v239_v35, %v240_v37 }
 0x35a   :  { %2202 = vtanh.f32 %v241_v38 }
 0x367   :  { %v2203_v39 = vpop.eup %2202 }
 0x368   :  { %v243_v40 = vmul.f32 0.5, %v2203_v39 }
 0x36a   :  { %v244_v41 = vadd.f32 0.5, %v243_v40  ;;  %v2342_v40 = vmov 4  }
 0x36c   :  { %v245_v42 = vsel %vm2427_vm2, %v2203_v39, %v244_v41 }
 0x36d   :  { %248 = vrot.lane.b32.xlu0 %v245_v42, %s2335_s0  ;;  %v246_v45 = vmul.f32 %v245_v42, %v2437_v20 }
 0x3df   :  { %v249_v43 = vpop.permute.xlu0 %248 }
 0x3e0   :  { %v251_v44 = vmul.f32 %v249_v43, %v245_v42 }
 0x3e2   :  { %253 = vrot.lane.b32.xlu1 %v251_v44, %s2336_s2 }
 0x454   :  { %v254_v46 = vpop.permute.xlu1 %253 }
 0x455   :  { %v256_v47 = vadd.f32 %v254_v46, %v246_v45 }
 0x457   :  { %2204 = vtanh.f32 %v256_v47 }
 0x464   :  { %v2205_v48 = vpop.eup %2204 }
 0x465   :  { %259 = vrot.lane.b32.xlu0 %v2205_v48, %s2335_s0 }
 0x469   :  { %105 = vperm.xlu0 %2190, %v2412_v1  }
 0x46d   :  { %2191 = vset.pattern.permute.xlu0 %v2341_v12 }
 0x4d7   :  { %v260_v50 = vpop.permute.xlu0 %259 }
 0x4d8   :  { %v262_v51 = vmul.f32 %v260_v50, %v245_v42 }
 0x4da   :  { %264 = vrot.lane.b32.xlu1 %v262_v51, %s2336_s2 }
 0x4e4   :  { %v106_v53 = vpop.permute.xlu0 %105 }
 0x4e5   :  { %v108_v54 = vmul.f32 %v2418_v4, %v106_v53 }
 0x4e7   :  { %v109_v55 = vadd.f32 %v2423_v5, %v108_v54 }
 0x54c   :  { %v2512_v52 = vpop.permute.xlu1 %264 }
 0x54d   :  { %2006 = vmatmul.mubr.msk.f32.vlgmr.msra.gmra.mxu1 %vm166_vm4, %v2512_v52 }
 0x54e   :  { %2020 = vmatpush3.msra.mxu1 %v2443_v21  ;;  %2027 = vmatprep.mubr.msk.f32.mxu1 %vm2338_vm3, %v2337_v22 }
 0x54f   :  { %2021 = vmatprep.subr.mxu1 %v2337_v22 }
 0x550   :  { %2022 = vmatpush3.msra.mxu1 %v2449_v23 }
 0x551   :  { %2023 = vmatprep.subr.mxu1 %v2337_v22 }
 0x552   :  { %2024 = vmatpush3.msra.mxu1 %v2459_v24 }
 0x553   :  { %2025 = vmatprep.subr.mxu1 %v2337_v22 }
 0x554   :  { %2026 = vmatpush3.msra.mxu1 %v2468_v25 }
 0x555   :  { %2041 = vmatprep.subr.mxu1 %v2337_v22 }
 0x60d   :  { %v334_v56 = vpop.f32.mrf.mxu1 }
 0x60e   :  { %v338_v57 = vadd.f32 %v334_v56, %v109_v55 }
 0x60f   :  { %v2007_v58 = vpop.f32.mrf.mxu1 }
 0x610   :  { %v339_v59 = vmul.f32 0.5, %v338_v57 }
 0x612   :  { %v340_v60 = vsel %vm2427_vm2, %v338_v57, %v339_v59 }
 0x613   :  { %2206 = vtanh.f32 %v340_v60 }
 0x620   :  { %v2207_v61 = vpop.eup %2206 }
 0x621   :  { %v342_v62 = vmul.f32 0.5, %v2207_v61 }
 0x623   :  { %v343_v63 = vadd.f32 0.5, %v342_v62 }
 0x625   :  { %v344_v2 = vsel %vm2427_vm2, %v2207_v61, %v343_v63  ;;  %v2343_v63 = vmov 5  }
 0x626   :  { %347 = vrot.lane.b32.xlu1 %v344_v2, %s2335_s0  ;;  %v345_v7 = vmul.f32 %v344_v2, %v256_v47 }
 0x698   :  { %v348_v3 = vpop.permute.xlu1 %347 }
 0x699   :  { %v350_v6 = vmul.f32 %v348_v3, %v344_v2 }
 0x69b   :  { %352 = vrot.lane.b32.xlu1 %v350_v6, %s2336_s2 }
 0x70d   :  { %v353_v8 = vpop.permute.xlu1 %352 }
 0x70e   :  { %v355_v10 = vadd.f32 %v353_v8, %v345_v7 }
 0x710   :  { %2208 = vtanh.f32 %v355_v10 }
 0x71d   :  { %v2209_v11 = vpop.eup %2208 }
 0x71e   :  { %358 = vrot.lane.b32.xlu0 %v2209_v11, %s2335_s0 }
 0x722   :  { %111 = vperm.xlu0 %2191, %v2412_v1  }
 0x726   :  { %2192 = vset.pattern.permute.xlu0 %v2342_v40 }
 0x790   :  { %v359_v13 = vpop.permute.xlu0 %358 }
 0x791   :  { %v361_v14 = vmul.f32 %v359_v13, %v344_v2 }
 0x793   :  { %363 = vrot.lane.b32.xlu1 %v361_v14, %s2336_s2 }
 0x79d   :  { %v112_v16 = vpop.permute.xlu0 %111 }
 0x79e   :  { %v114_v17 = vmul.f32 %v2418_v4, %v112_v16 }
 0x7a0   :  { %v115_v18 = vadd.f32 %v2423_v5, %v114_v17 }
 0x805   :  { %v2537_v15 = vpop.permute.xlu1 %363 }
 0x806   :  { %2017 = vmatmul.mubr.msk.f32.vlgmr.msra.gmra.mxu0 %vm166_vm4, %v2537_v15 }
 0x807   :  { %2031 = vmatpush3.msra.mxu0 %v2443_v21  ;;  %2038 = vmatprep.mubr.msk.f32.mxu0 %vm2338_vm3, %v2337_v22 }
 0x808   :  { %2032 = vmatprep.subr.mxu0 %v2337_v22 }
 0x809   :  { %2033 = vmatpush3.msra.mxu0 %v2449_v23 }
 0x80a   :  { %2034 = vmatprep.subr.mxu0 %v2337_v22 }
 0x80b   :  { %2035 = vmatpush3.msra.mxu0 %v2459_v24 }
 0x80c   :  { %2036 = vmatprep.subr.mxu0 %v2337_v22 }
 0x80d   :  { %2037 = vmatpush3.msra.mxu0 %v2468_v25 }
 0x80e   :  { %2052 = vmatprep.subr.mxu0 %v2337_v22 }
 0x8c6   :  { %v433_v19 = vpop.f32.mrf.mxu0 }
 0x8c7   :  { %v437_v20 = vadd.f32 %v433_v19, %v115_v18 }
 0x8c8   :  { %v2018_v26 = vpop.f32.mrf.mxu0 }
 0x8c9   :  { %v438_v27 = vmul.f32 0.5, %v437_v20 }
 0x8cb   :  { %v439_v28 = vsel %vm2427_vm2, %v437_v20, %v438_v27  ;;  %v860_v27 = vld [vmem:[#allocation2 + $0x18] sm:$0xff] }
 0x8cc   :  { %2210 = vtanh.f32 %v439_v28 }
 0x8d9   :  { %v2211_v29 = vpop.eup %2210 }
 0x8da   :  { %v441_v31 = vmul.f32 0.5, %v2211_v29 }
 0x8dc   :  { %v442_v32 = vadd.f32 0.5, %v441_v31 }
 0x8de   :  { %v443_v33 = vsel %vm2427_vm2, %v2211_v29, %v442_v32  ;;  %v2344_v32 = vmov 6  }
 0x8df   :  { %446 = vrot.lane.b32.xlu1 %v443_v33, %s2335_s0  ;;  %v444_v36 = vmul.f32 %v443_v33, %v355_v10 }
 0x951   :  { %v447_v34 = vpop.permute.xlu1 %446 }
 0x952   :  { %v449_v35 = vmul.f32 %v447_v34, %v443_v33  ;;  %v859_v34 = vld [vmem:[#allocation2 + $0x10] sm:$0xff] }
 0x954   :  { %451 = vrot.lane.b32.xlu1 %v449_v35, %s2336_s2  ;;  %v858_v35 = vld [vmem:[#allocation2 + $0x8] sm:$0xff] }
 0x9c6   :  { %v452_v37 = vpop.permute.xlu1 %451 }
 0x9c7   :  { %v454_v38 = vadd.f32 %v452_v37, %v444_v36  ;;  %v857_v36 = vld [vmem:[#allocation2] sm:$0xff] }
 0x9c9   :  { %2212 = vtanh.f32 %v454_v38 }
 0x9d6   :  { %v2213_v39 = vpop.eup %2212 }
 0x9d7   :  { %457 = vrot.lane.b32.xlu0 %v2213_v39, %s2335_s0 }
 0x9db   :  { %117 = vperm.xlu0 %2192, %v2412_v1  }
 0x9df   :  { %2193 = vset.pattern.permute.xlu0 %v2343_v63 }
 0xa49   :  { %v458_v41 = vpop.permute.xlu0 %457 }
 0xa4a   :  { %v460_v42 = vmul.f32 %v458_v41, %v443_v33 }
 0xa4c   :  { %462 = vrot.lane.b32.xlu1 %v460_v42, %s2336_s2 }
 0xa56   :  { %v118_v44 = vpop.permute.xlu0 %117 }
 0xa57   :  { %v120_v45 = vmul.f32 %v2418_v4, %v118_v44 }
 0xa59   :  { %v121_v46 = vadd.f32 %v2423_v5, %v120_v45 }
 0xabe   :  { %v2562_v43 = vpop.permute.xlu1 %462 }
 0xabf   :  { %2028 = vmatmul.mubr.msk.f32.vlgmr.msra.gmra.mxu1 %vm166_vm4, %v2562_v43 }
 0xac0   :  { %2042 = vmatpush3.msra.mxu1 %v2443_v21  ;;  %2049 = vmatprep.mubr.msk.f32.mxu1 %vm2338_vm3, %v2337_v22 }
 0xac1   :  { %2043 = vmatprep.subr.mxu1 %v2337_v22 }
 0xac2   :  { %2044 = vmatpush3.msra.mxu1 %v2449_v23 }
 0xac3   :  { %2045 = vmatprep.subr.mxu1 %v2337_v22 }
 0xac4   :  { %2046 = vmatpush3.msra.mxu1 %v2459_v24 }
 0xac5   :  { %2047 = vmatprep.subr.mxu1 %v2337_v22 }
 0xac6   :  { %2048 = vmatpush3.msra.mxu1 %v2468_v25 }
 0xac7   :  { %2063 = vmatprep.subr.mxu1 %v860_v27 }
 0xb7f   :  { %v532_v47 = vpop.f32.mrf.mxu1 }
 0xb80   :  { %v536_v48 = vadd.f32 %v532_v47, %v121_v46 }
 0xb81   :  { %v2029_v49 = vpop.f32.mrf.mxu1 }
 0xb82   :  { %v537_v50 = vmul.f32 0.5, %v536_v48 }
 0xb84   :  { %v538_v51 = vsel %vm2427_vm2, %v536_v48, %v537_v50 }
 0xb85   :  { %2214 = vtanh.f32 %v538_v51 }
 0xb92   :  { %v2215_v53 = vpop.eup %2214 }
 0xb93   :  { %v540_v54 = vmul.f32 0.5, %v2215_v53 }
 0xb95   :  { %v541_v55 = vadd.f32 0.5, %v540_v54 }
 0xb97   :  { %v542_v56 = vsel %vm2427_vm2, %v2215_v53, %v541_v55 }
 0xb98   :  { %545 = vrot.lane.b32.xlu1 %v542_v56, %s2335_s0  ;;  %v543_v59 = vmul.f32 %v542_v56, %v454_v38 }
 0xc0a   :  { %v546_v57 = vpop.permute.xlu1 %545 }
 0xc0b   :  { %v548_v58 = vmul.f32 %v546_v57, %v542_v56 }
 0xc0d   :  { %550 = vrot.lane.b32.xlu1 %v548_v58, %s2336_s2 }
 0xc7f   :  { %v551_v60 = vpop.permute.xlu1 %550 }
 0xc80   :  { %v553_v61 = vadd.f32 %v551_v60, %v543_v59 }
 0xc82   :  { %2216 = vtanh.f32 %v553_v61 }
 0xc8f   :  { %v2217_v62 = vpop.eup %2216 }
 0xc90   :  { %556 = vrot.lane.b32.xlu0 %v2217_v62, %s2335_s0 }
 0xc94   :  { %123 = vperm.xlu0 %2193, %v2412_v1  }
 0xc98   :  { %2194 = vset.pattern.permute.xlu0 %v2344_v32 }
 0xd02   :  { %v557_v2 = vpop.permute.xlu0 %556 }
 0xd03   :  { %v559_v3 = vmul.f32 %v557_v2, %v542_v56 }
 0xd05   :  { %561 = vrot.lane.b32.xlu1 %v559_v3, %s2336_s2 }
 0xd0f   :  { %v124_v7 = vpop.permute.xlu0 %123 }
 0xd77   :  { %v562_v6 = vpop.permute.xlu1 %561 }
 0xd78   :  { %2039 = vmatmul.mubr.msk.f32.vlgmr.msra.gmra.mxu0 %vm166_vm4, %v562_v6 }
 0xd79   :  { %2053 = vmatpush3.msra.mxu0 %v2443_v21  ;;  %2060 = vmatprep.mubr.msk.f32.mxu0 %vm2338_vm3, %v2337_v22  ;;  %v126_v21 = vmul.f32 %v2418_v4, %v124_v7 }
 0xd7a   :  { %2054 = vmatprep.subr.mxu0 %v2337_v22 }
 0xd7b   :  { %2055 = vmatpush3.msra.mxu0 %v2449_v23  ;;  %v127_v8 = vadd.f32 %v2423_v5, %v126_v21 }
 0xd7c   :  { %2056 = vmatprep.subr.mxu0 %v2337_v22 }
 0xd7d   :  { %2057 = vmatpush3.msra.mxu0 %v2459_v24 }
 0xd7e   :  { %2058 = vmatprep.subr.mxu0 %v2337_v22 }
 0xd7f   :  { %2059 = vmatpush3.msra.mxu0 %v2468_v25 }
 0xd80   :  { %2083 = vmatprep.subr.mxu0 %v2337_v22 }
 0xe38   :  { %v631_v10 = vpop.f32.mrf.mxu0 }
 0xe39   :  { %v635_v11 = vadd.f32 %v631_v10, %v127_v8  ;;  %v2654_v8 = vld [vmem:[#allocation5 + $0x18] sm:$0xff]  ;;  %v2657_v10 = vld [vmem:[#allocation5 + $0x10] sm:$0xff] }
 0xe3a   :  { %v2040_v12 = vpop.f32.mrf.mxu0 }
 0xe3b   :  { %v636_v13 = vmul.f32 0.5, %v635_v11  ;;  %v2666_v12 = vld [vmem:[#allocation5] sm:$0xff] }
 0xe3d   :  { %v637_v23 = vsel %vm2427_vm2, %v635_v11, %v636_v13  ;;  %v2661_v11 = vld [vmem:[#allocation5 + $0x8] sm:$0xff] }
 0xe3e   :  { %2218 = vtanh.f32 %v637_v23 }
 0xe4b   :  { %v2219_v24 = vpop.eup %2218 }
 0xe4c   :  { %v639_v14 = vmul.f32 0.5, %v2219_v24 }
 0xe4e   :  { %v640_v16 = vadd.f32 0.5, %v639_v14 }
 0xe50   :  { %v641_v25 = vsel %vm2427_vm2, %v2219_v24, %v640_v16 }
 0xe51   :  { %644 = vrot.lane.b32.xlu1 %v641_v25, %s2335_s0  ;;  %v642_v19 = vmul.f32 %v641_v25, %v553_v61 }
 0xec3   :  { %v645_v17 = vpop.permute.xlu1 %644 }
 0xec4   :  { %v647_v18 = vmul.f32 %v645_v17, %v641_v25 }
 0xec6   :  { %649 = vrot.lane.b32.xlu1 %v647_v18, %s2336_s2 }
 0xf38   :  { %v650_v20 = vpop.permute.xlu1 %649 }
 0xf39   :  { %v2605_v26 = vadd.f32 %v650_v20, %v642_v19 }
 0xf3b   :  { %2220 = vtanh.f32 %v2605_v26 }
 0xf48   :  { %v2221_v28 = vpop.eup %2220 }
 0xf49   :  { %655 = vrot.lane.b32.xlu0 %v2221_v28, %s2335_s0 }
 0xf4d   :  { %129 = vperm.xlu0 %2194, %v2412_v1  }
 0xfbb   :  { %v656_v29 = vpop.permute.xlu0 %655 }
 0xfbc   :  { %v658_v31 = vmul.f32 %v656_v29, %v641_v25 }
 0xfbe   :  { %660 = vrot.lane.b32.xlu1 %v658_v31, %s2336_s2 }
0x1030   :  { %v661_v33 = vpop.permute.xlu1 %660 }
0x1031   :  { %2050 = vmatmul.mubr.msk.f32.vlgmr.msra.gmra.mxu1 %vm166_vm4, %v661_v33 }
0x1032   :  { %2064 = vmatpush3.msra.mxu1 %v860_v27  ;;  %2071 = vmatprep.mubr.msk.f32.mxu1 %vm166_vm4, %v2486_v30  ;;  %v130_v30 = vpop.permute.xlu0 %129 }
0x1033   :  { %2065 = vmatprep.subr.mxu1 %v859_v34  ;;  %v132_v37 = vmul.f32 %v2418_v4, %v130_v30  ;;  %v2345_v30 = vmov 7  }
0x1034   :  { %2066 = vmatpush3.msra.mxu1 %v859_v34  ;;  %2195 = vset.pattern.permute.xlu0 %v2345_v30 }
0x1035   :  { %2067 = vmatprep.subr.mxu1 %v858_v35  ;;  %v133_v38 = vadd.f32 %v2423_v5, %v132_v37 }
0x1036   :  { %2068 = vmatpush3.msra.mxu1 %v858_v35 }
0x1037   :  { %2069 = vmatprep.subr.mxu1 %v857_v36 }
0x1038   :  { %2070 = vmatpush3.msra.mxu1 %v857_v36 }
0x1039   :  { %2072 = vmatmul.mubr.msk.f32.vlgmr.msra.gmra.mxu1 %vm166_vm4, %v2512_v52  ;;  %2105 = vmatprep.subr.mxu1 %v2337_v22 }
0x103a   :  { %2074 = vmatprep.mubr.msk.f32.mxu1 %vm166_vm4, %v2537_v15  ;;  %2106 = vmatpush3.msra.mxu1 %v2654_v8 }
0x103b   :  { %2107 = vmatprep.subr.mxu1 %v2337_v22 }
0x103c   :  { %2108 = vmatpush3.msra.mxu1 %v2657_v10 }
0x103d   :  { %2075 = vmatmul.mubr.msk.f32.gmra.mxu1 %vm166_vm4, %v2562_v43  ;;  %v2632_v43 = vld [vmem:[%s2910_s7] ss:$0 sm:$0xff]  ;;  %2109 = vmatprep.subr.mxu1 %v2337_v22 }
0x103e   :  { %2077 = vmatprep.mubr.msk.f32.mxu1 %vm166_vm4, %v562_v6  ;;  %2110 = vmatpush3.msra.mxu1 %v2661_v11 }
0x103f   :  { %2111 = vmatprep.subr.mxu1 %v2337_v22 }
0x1040   :  { %2112 = vmatpush3.msra.mxu1 %v2666_v12 }
0x1041   :  { %2078 = vmatmul.mubr.msk.f32.gmra.mxu1 %vm166_vm4, %v661_v33  ;;  %2127 = vmatprep.subr.mxu1 %v2337_v22 }
0x10f1   :  { %v730_v39 = vpop.f32.mrf.mxu1 }
0x10f2   :  { %v734_v40 = vadd.f32 %v730_v39, %v133_v38 }
0x10f3   :  { %v2051_v52 = vpop.f32.mrf.mxu1 }
0x10f4   :  { %v735_v41 = vmul.f32 0.5, %v734_v40 }
0x10f6   :  { %v736_v42 = vsel %vm2427_vm2, %v734_v40, %v735_v41 }
0x10f7   :  { %2222 = vtanh.f32 %v736_v42 }
0x10f9   :  { %v2627_v15 = vpop.f32.mrf.mxu1 }
0x10fa   :  { %v949_v19 = vadd.f32 %v2627_v15, %v2632_v43 }
0x10fb   :  { %v943_v44 = vpop.f32.mrf.mxu1 }
0x10fc   :  { %v944_v45 = vadd.f32 %v2632_v43, %v943_v44 }
0x10fe   :  { %v982_v46 = vmul.f32 0.5, %v944_v45 }
0x1100   :  { %v983_v47 = vsel %vm2427_vm2, %v944_v45, %v982_v46 }
0x1101   :  { %2224 = vtanh.f32 %v983_v47 }
0x1104   :  { %v2223_v48 = vpop.eup %2222 }
0x1105   :  { %v738_v49 = vmul.f32 0.5, %v2223_v48 }
0x1107   :  { %v739_v50 = vadd.f32 0.5, %v738_v49 }
0x1109   :  { %v740_v51 = vsel %vm2427_vm2, %v2223_v48, %v739_v50 }
0x110a   :  { %743 = vrot.lane.b32.xlu1 %v740_v51, %s2335_s0  ;;  %v741_v61 = vmul.f32 %v740_v51, %v2605_v26 }
0x110e   :  { %v2225_v53 = vpop.eup %2224 }
0x110f   :  { %v985_v54 = vmul.f32 0.5, %v2225_v53 }
0x1111   :  { %v986_v55 = vadd.f32 0.5, %v985_v54 }
0x1113   :  { %v987_v56 = vsel %vm2427_vm2, %v2225_v53, %v986_v55 }
0x1114   :  { %990 = vrot.lane.b32.xlu1 %v987_v56, %s2335_s0  ;;  %v988_v2 = vmul.f32 0.0, %v987_v56 }
0x117c   :  { %v744_v57 = vpop.permute.xlu1 %743 }
0x117d   :  { %v746_v58 = vmul.f32 %v744_v57, %v740_v51  ;;  %v2076_v57 = vpop.f32.mrf.mxu1 }
0x117f   :  { %748 = vrot.lane.b32.xlu0 %v746_v58, %s2336_s2  ;;  %v953_v58 = vpop.f32.mrf.mxu1 }
0x1186   :  { %v991_v59 = vpop.permute.xlu1 %990 }
0x1187   :  { %v993_v60 = vmul.f32 %v991_v59, %v987_v56  ;;  %v954_v59 = vadd.f32 %v2632_v43, %v953_v58 }
0x1189   :  { %995 = vrot.lane.b32.xlu1 %v993_v60, %s2336_s2 }
0x11f1   :  { %v749_v62 = vpop.permute.xlu0 %748 }
0x11f2   :  { %v2646_v63 = vadd.f32 %v749_v62, %v741_v61 }
0x11f4   :  { %2226 = vtanh.f32 %v2646_v63 }
0x11fb   :  { %v996_v3 = vpop.permute.xlu1 %995 }
0x11fc   :  { %v2649_v6 = vadd.f32 %v996_v3, %v988_v2 }
0x11fe   :  { %2228 = vtanh.f32 %v2649_v6 }
0x1201   :  { %v2227_v7 = vpop.eup %2226 }
0x1202   :  { %754 = vrot.lane.b32.xlu0 %v2227_v7, %s2335_s0 }
0x120b   :  { %v2229_v21 = vpop.eup %2228 }
0x120c   :  { %1001 = vrot.lane.b32.xlu1 %v2229_v21, %s2335_s0 }
0x1274   :  { %v755_v13 = vpop.permute.xlu0 %754 }
0x1275   :  { %v757_v23 = vmul.f32 %v755_v13, %v740_v51 }
0x1277   :  { %759 = vrot.lane.b32.xlu0 %v757_v23, %s2336_s2 }
0x127e   :  { %v1002_v24 = vpop.permute.xlu1 %1001 }
0x127f   :  { %v2671_v14 = vmul.f32 %v1002_v24, %v987_v56 }
0x1281   :  { %1014 = vrot.lane.b32.xlu1 %v2671_v14, %s2336_s2 }
0x12e9   :  { %v760_v16 = vpop.permute.xlu0 %759 }
0x12ea   :  { %2061 = vmatmul.mubr.msk.f32.vlgmr.msra.gmra.mxu0 %vm166_vm4, %v760_v16  ;;  %2080 = vmatprep.mubr.msk.f32.mxu1 %vm166_vm4, %v760_v16 }
0x12eb   :  { %2084 = vmatpush3.msra.mxu0 %v2654_v8  ;;  %2091 = vmatprep.mubr.msk.f32.mxu0 %vm2338_vm3, %v2337_v22 }
0x12ec   :  { %2085 = vmatprep.subr.mxu0 %v2337_v22 }
0x12ed   :  { %2086 = vmatpush3.msra.mxu0 %v2657_v10 }
0x12ee   :  { %2087 = vmatprep.subr.mxu0 %v2337_v22 }
0x12ef   :  { %2088 = vmatpush3.msra.mxu0 %v2661_v11 }
0x12f0   :  { %2089 = vmatprep.subr.mxu0 %v2337_v22 }
0x12f1   :  { %2090 = vmatpush3.msra.mxu0 %v2666_v12 }
0x12f2   :  { %2094 = vmatprep.subr.mxu0 %v2337_v22 }
0x12f3   :  { %v1015_v25 = vpop.permute.xlu1 %1014 }
0x12f4   :  { %2092 = vmatmul.mubr.msk.f32.vlgmr.msra.gmra.mxu0 %vm166_vm4, %v1015_v25 }
0x12f5   :  { %2095 = vmatpush3.msra.mxu0 %v2654_v8  ;;  %2102 = vmatprep.mubr.msk.f32.mxu0 %vm2338_vm3, %v2337_v22 }
0x12f6   :  { %2096 = vmatprep.subr.mxu0 %v2337_v22 }
0x12f7   :  { %2097 = vmatpush3.msra.mxu0 %v2657_v10 }
0x12f8   :  { %2098 = vmatprep.subr.mxu0 %v2337_v22 }
0x12f9   :  { %2099 = vmatpush3.msra.mxu0 %v2661_v11 }
0x12fa   :  { %2100 = vmatprep.subr.mxu0 %v2337_v22 }
0x12fb   :  { %2101 = vmatpush3.msra.mxu0 %v2666_v12 }
0x12fc   :  { %2116 = vmatprep.subr.mxu0 %v2337_v22 }
0x13aa   :  { %v829_v17 = vpop.f32.mrf.mxu0 }
0x13ac   :  { %v2062_v18 = vpop.f32.mrf.mxu0 }
0x13b4   :  { %v1084_v20 = vpop.f32.mrf.mxu0 }
0x13b5   :  { %v1088_v26 = vadd.f32 %v1084_v20, %v949_v19 }
0x13b6   :  { %v2093_v27 = vpop.f32.mrf.mxu0 }
0x13b7   :  { %v1089_v28 = vmul.f32 0.5, %v1088_v26 }
0x13b9   :  { %v1090_v29 = vsel %vm2427_vm2, %v1088_v26, %v1089_v28 }
0x13ba   :  { %2230 = vtanh.f32 %v1090_v29  ;;  %v2766_v29 = vpop.f32.mrf.mxu1 }
0x13c7   :  { %v2231_v31 = vpop.eup %2230 }
0x13c8   :  { %v1092_v32 = vmul.f32 0.5, %v2231_v31 }
0x13ca   :  { %v1093_v33 = vadd.f32 0.5, %v1092_v32 }
0x13cc   :  { %v1094_v34 = vsel %vm2427_vm2, %v2231_v31, %v1093_v33  ;;  %v963_v31 = vpop.f32.mrf.mxu1 }
0x13cd   :  { %1097 = vrot.lane.b32.xlu0 %v1094_v34, %s2335_s0  ;;  %v1095_v37 = vmul.f32 %v1094_v34, %v2649_v6 }
0x143f   :  { %v1098_v35 = vpop.permute.xlu0 %1097 }
0x1440   :  { %v1100_v36 = vmul.f32 %v1098_v35, %v1094_v34 }
0x1442   :  { %1102 = vrot.lane.b32.xlu1 %v1100_v36, %s2336_s2 }
0x14b4   :  { %v1103_v38 = vpop.permute.xlu1 %1102 }
0x14b5   :  { %v2707_v39 = vadd.f32 %v1103_v38, %v1095_v37 }
0x14b7   :  { %2232 = vtanh.f32 %v2707_v39 }
0x14c4   :  { %v2233_v40 = vpop.eup %2232 }
0x14c5   :  { %1108 = vrot.lane.b32.xlu0 %v2233_v40, %s2335_s0 }
0x14c9   :  { %135 = vperm.xlu0 %2195, %v2412_v1  }
0x14cd   :  { %2196 = vset.pattern.permute.xlu0 %v2334_v0 }
0x1537   :  { %v1109_v52 = vpop.permute.xlu0 %1108 }
0x1538   :  { %v2713_v41 = vmul.f32 %v1109_v52, %v1094_v34  ;;  %v959_v34 = vadd.f32 %v2076_v57, %v2632_v43 }
0x153a   :  { %1121 = vrot.lane.b32.xlu1 %v2713_v41, %s2336_s2 }
0x1544   :  { %v136_v42 = vpop.permute.xlu0 %135 }
0x1545   :  { %v138_v15 = vmul.f32 %v2418_v4, %v136_v42 }
0x1547   :  { %v139_v44 = vadd.f32 %v2423_v5, %v138_v15 }
0x1549   :  { %v833_v45 = vadd.f32 %v829_v17, %v139_v44 }
0x154b   :  { %v834_v46 = vmul.f32 0.5, %v833_v45 }
0x154d   :  { %v835_v47 = vsel %vm2427_vm2, %v833_v45, %v834_v46 }
0x154e   :  { %2234 = vtanh.f32 %v835_v47 }
0x155b   :  { %v2235_v1 = vpop.eup %2234 }
0x155c   :  { %v837_v48 = vmul.f32 0.5, %v2235_v1 }
0x155e   :  { %v838_v49 = vadd.f32 0.5, %v837_v48 }
0x1560   :  { %v839_v50 = vsel %vm2427_vm2, %v2235_v1, %v838_v49 }
0x1561   :  { %842 = vrot.lane.b32.xlu1 %v839_v50, %s2335_s0  ;;  %v840_v53 = vmul.f32 %v839_v50, %v2646_v63 }
0x15ac   :  { %v1122_v51 = vpop.permute.xlu1 %1121 }
0x15ad   :  { %2103 = vmatmul.mubr.msk.f32.vlgmr.msra.gmra.mxu0 %vm166_vm4, %v1122_v51  ;;  %v964_v51 = vadd.f32 %v2632_v43, %v963_v31 }
0x15ae   :  { %2117 = vmatpush3.msra.mxu0 %v2654_v8  ;;  %2124 = vmatprep.mubr.msk.f32.mxu0 %vm2338_vm3, %v2337_v22 }
0x15af   :  { %2118 = vmatprep.subr.mxu0 %v2337_v22 }
0x15b0   :  { %2119 = vmatpush3.msra.mxu0 %v2657_v10 }
0x15b1   :  { %2120 = vmatprep.subr.mxu0 %v2337_v22 }
0x15b2   :  { %2121 = vmatpush3.msra.mxu0 %v2661_v11 }
0x15b3   :  { %2122 = vmatprep.subr.mxu0 %v2337_v22 }
0x15b4   :  { %2123 = vmatpush3.msra.mxu0 %v2666_v12 }
0x15b5   :  { %2138 = vmatprep.subr.mxu0 %v2337_v22 }
0x15d3   :  { %v843_v4 = vpop.permute.xlu1 %842 }
0x15d4   :  { %v845_v5 = vmul.f32 %v843_v4, %v839_v50 }
0x15d6   :  { %847 = vrot.lane.b32.xlu0 %v845_v5, %s2336_s2 }
0x1648   :  { %v848_v54 = vpop.permute.xlu0 %847 }
0x1649   :  { %v850_v55 = vadd.f32 %v848_v54, %v840_v53 }
0x164b   :  { %2236 = vtanh.f32 %v850_v55 }
0x1658   :  { %v2237_v56 = vpop.eup %2236 }
0x1659   :  { %853 = vrot.lane.b32.xlu0 %v2237_v56, %s2335_s0 }
0x166d   :  { %v1191_v60 = vpop.f32.mrf.mxu0 }
0x166e   :  { %v1195_v61 = vadd.f32 %v1191_v60, %v954_v59 }
0x166f   :  { %v2104_v62 = vpop.f32.mrf.mxu0 }
0x1670   :  { %v1196_v2 = vmul.f32 0.5, %v1195_v61 }
0x1672   :  { %v1197_v3 = vsel %vm2427_vm2, %v1195_v61, %v1196_v2 }
0x1673   :  { %2238 = vtanh.f32 %v1197_v3 }
0x1680   :  { %v2239_v6 = vpop.eup %2238 }
0x1681   :  { %v1199_v63 = vmul.f32 0.5, %v2239_v6 }
0x1683   :  { %v1200_v7 = vadd.f32 0.5, %v1199_v63 }
0x1685   :  { %v1201_v21 = vsel %vm2427_vm2, %v2239_v6, %v1200_v7 }
0x1686   :  { %1204 = vrot.lane.b32.xlu1 %v1201_v21, %s2335_s0  ;;  %v1202_v17 = vmul.f32 %v1201_v21, %v2707_v39 }
0x16cb   :  { %v854_v13 = vpop.permute.xlu0 %853 }
0x16cc   :  { %v856_v23 = vmul.f32 %v854_v13, %v839_v50  ;;  %v969_v13 = vadd.f32 %v2766_v29, %v2632_v43 }
0x16ce   :  { %873 = vrot.lane.b32.xlu0 %v856_v23, %s2336_s2 }
0x16f8   :  { %v1205_v24 = vpop.permute.xlu1 %1204 }
0x16f9   :  { %v1207_v16 = vmul.f32 %v1205_v24, %v1201_v21 }
0x16fb   :  { %1209 = vrot.lane.b32.xlu1 %v1207_v16, %s2336_s2 }
0x1740   :  { %v874_v25 = vpop.permute.xlu0 %873 }
0x1741   :  { %2081 = vmatmul.mubr.msk.f32.gmra.mxu1 %vm166_vm4, %v874_v25 }
0x1742   :  { %2113 = vmatprep.mubr.msk.f32.mxu1 %vm2338_vm3, %v2337_v22 }
0x176d   :  { %v1210_v18 = vpop.permute.xlu1 %1209 }
0x176e   :  { %v1212_v19 = vadd.f32 %v1210_v18, %v1202_v17 }
0x1770   :  { %2240 = vtanh.f32 %v1212_v19 }
0x177d   :  { %v2241_v20 = vpop.eup %2240 }
0x177e   :  { %1215 = vrot.lane.b32.xlu1 %v2241_v20, %s2335_s0 }
0x17f0   :  { %v1216_v26 = vpop.permute.xlu1 %1215 }
0x17f1   :  { %v2751_v27 = vmul.f32 %v1216_v26, %v1201_v21 }
0x17f3   :  { %1228 = vrot.lane.b32.xlu1 %v2751_v27, %s2336_s2 }
0x1801   :  { %v2768_v32 = vpop.f32.mrf.mxu1 }
0x1803   :  { %v2770_v33 = vpop.f32.mrf.mxu1 }
0x1865   :  { %v1229_v28 = vpop.permute.xlu1 %1228 }
0x1866   :  { %2114 = vmatmul.mubr.msk.f32.vlgmr.msra.gmra.mxu1 %vm166_vm4, %v1229_v28 }
0x1867   :  { %2128 = vmatpush3.msra.mxu1 %v2654_v8  ;;  %2135 = vmatprep.mubr.msk.f32.mxu1 %vm2338_vm3, %v2337_v22 }
0x1868   :  { %2129 = vmatprep.subr.mxu1 %v2337_v22 }
0x1869   :  { %2130 = vmatpush3.msra.mxu1 %v2657_v10 }
0x186a   :  { %2131 = vmatprep.subr.mxu1 %v2337_v22 }
0x186b   :  { %2132 = vmatpush3.msra.mxu1 %v2661_v11 }
0x186c   :  { %2133 = vmatprep.subr.mxu1 %v2337_v22 }
0x186d   :  { %2134 = vmatpush3.msra.mxu1 %v2666_v12 }
0x186e   :  { %2149 = vmatprep.subr.mxu1 %v2337_v22 }
0x1926   :  { %v1298_v35 = vpop.f32.mrf.mxu1 }
0x1927   :  { %v1302_v36 = vadd.f32 %v1298_v35, %v959_v34 }
0x1928   :  { %v2115_v30 = vpop.f32.mrf.mxu1 }
0x1929   :  { %v1303_v37 = vmul.f32 0.5, %v1302_v36 }
0x192b   :  { %v1304_v38 = vsel %vm2427_vm2, %v1302_v36, %v1303_v37  ;;  %v974_v36 = vadd.f32 %v2632_v43, %v2770_v33 }
0x192c   :  { %2242 = vtanh.f32 %v1304_v38 }
0x1939   :  { %v2243_v39 = vpop.eup %2242 }
0x193a   :  { %v1306_v40 = vmul.f32 0.5, %v2243_v39 }
0x193c   :  { %v1307_v52 = vadd.f32 0.5, %v1306_v40 }
0x193e   :  { %v1308_v42 = vsel %vm2427_vm2, %v2243_v39, %v1307_v52 }
0x193f   :  { %1311 = vrot.lane.b32.xlu0 %v1308_v42, %s2335_s0  ;;  %v1309_v45 = vmul.f32 %v1308_v42, %v1212_v19 }
0x19b1   :  { %v1312_v15 = vpop.permute.xlu0 %1311 }
0x19b2   :  { %v1314_v44 = vmul.f32 %v1312_v15, %v1308_v42 }
0x19b4   :  { %1316 = vrot.lane.b32.xlu1 %v1314_v44, %s2336_s2 }
0x1a26   :  { %v1317_v46 = vpop.permute.xlu1 %1316 }
0x1a27   :  { %v1319_v47 = vadd.f32 %v1317_v46, %v1309_v45 }
0x1a29   :  { %2244 = vtanh.f32 %v1319_v47 }
0x1a36   :  { %v2245_v1 = vpop.eup %2244 }
0x1a37   :  { %1322 = vrot.lane.b32.xlu0 %v2245_v1, %s2335_s0 }
0x1aa9   :  { %v1323_v48 = vpop.permute.xlu0 %1322 }
0x1aaa   :  { %v2780_v49 = vmul.f32 %v1323_v48, %v1308_v42 }
0x1aac   :  { %1335 = vrot.lane.b32.xlu1 %v2780_v49, %s2336_s2 }
0x1b1e   :  { %v1336_v50 = vpop.permute.xlu1 %1335 }
0x1b1f   :  { %2125 = vmatmul.mubr.msk.f32.vlgmr.msra.gmra.mxu0 %vm166_vm4, %v1336_v50 }
0x1b20   :  { %2139 = vmatpush3.msra.mxu0 %v2654_v8  ;;  %2146 = vmatprep.mubr.msk.f32.mxu0 %vm2338_vm3, %v2337_v22 }
0x1b21   :  { %2140 = vmatprep.subr.mxu0 %v2337_v22 }
0x1b22   :  { %2141 = vmatpush3.msra.mxu0 %v2657_v10 }
0x1b23   :  { %2142 = vmatprep.subr.mxu0 %v2337_v22 }
0x1b24   :  { %2143 = vmatpush3.msra.mxu0 %v2661_v11 }
0x1b25   :  { %2144 = vmatprep.subr.mxu0 %v2337_v22 }
0x1b26   :  { %2145 = vmatpush3.msra.mxu0 %v2666_v12 }
0x1b27   :  { %2160 = vmatprep.subr.mxu0 %v2337_v22 }
0x1bdf   :  { %v1405_v4 = vpop.f32.mrf.mxu0 }
0x1be0   :  { %v1409_v5 = vadd.f32 %v1405_v4, %v964_v51 }
0x1be1   :  { %v2126_v53 = vpop.f32.mrf.mxu0 }
0x1be2   :  { %v1410_v54 = vmul.f32 0.5, %v1409_v5 }
0x1be4   :  { %v1411_v55 = vsel %vm2427_vm2, %v1409_v5, %v1410_v54  ;;  %v979_v5 = vadd.f32 %v2768_v32, %v2632_v43 }
0x1be5   :  { %2246 = vtanh.f32 %v1411_v55 }
0x1bf2   :  { %v2247_v56 = vpop.eup %2246 }
0x1bf3   :  { %v1413_v57 = vmul.f32 0.5, %v2247_v56 }
0x1bf5   :  { %v1414_v58 = vadd.f32 0.5, %v1413_v57 }
0x1bf7   :  { %v1415_v59 = vsel %vm2427_vm2, %v2247_v56, %v1414_v58 }
0x1bf8   :  { %1418 = vrot.lane.b32.xlu0 %v1415_v59, %s2335_s0  ;;  %v1416_v62 = vmul.f32 %v1415_v59, %v1319_v47 }
0x1c6a   :  { %v1419_v60 = vpop.permute.xlu0 %1418 }
0x1c6b   :  { %v1421_v61 = vmul.f32 %v1419_v60, %v1415_v59  ;;  %v69_v60 = vld [vmem:[%s2904_s1] sm:$0xff] }
0x1c6c   :  { %vm1005_vm5 = vcmp.gt.f32.partialorder %v69_v60, 0.0  ;;  %vm1326_vm6 = vcmp.gt.f32.partialorder %v69_v60, 3.0  ;;  %vm1540_vm7 = vcmp.gt.f32.partialorder %v69_v60, 5.0  ;;  %vm1754_vm8 = vcmp.gt.f32.partialorder %v69_v60, 7.0 }
0x1c6d   :  { %1423 = vrot.lane.b32.xlu1 %v1421_v61, %s2336_s2  ;;  %v1006_v43 = vsel %vm1005_vm5, 1, %v2334_v0  ;;  %v1327_v32 = vsel %vm1326_vm6, 1, %v2334_v0  ;;  %v1755_v9 = vsel %vm1754_vm8, 1, %v2334_v0  ;;  %vm1112_vm9 = vcmp.gt.f32.partialorder %v69_v60, 1.0 }
0x1c6e   :  { %vm1219_vm10 = vcmp.gt.f32.partialorder %v69_v60, 2.0  ;;  %vm1433_vm11 = vcmp.gt.f32.partialorder %v69_v60, 4.0  ;;  %vm1647_vm12 = vcmp.gt.f32.partialorder %v69_v60, 6.0  ;;  %vm1854_vm6 = vcmask 39936  }
0x1cdf   :  { %v1424_v2 = vpop.permute.xlu1 %1423 }
0x1ce0   :  { %v1426_v3 = vadd.f32 %v1424_v2, %v1416_v62  ;;  %v1541_v2 = vsel %vm1540_vm7, 1, %v2334_v0 }
0x1ce2   :  { %2248 = vtanh.f32 %v1426_v3 }
0x1cef   :  { %v2249_v6 = vpop.eup %2248 }
0x1cf0   :  { %1429 = vrot.lane.b32.xlu0 %v2249_v6, %s2335_s0 }
0x1d62   :  { %v1430_v63 = vpop.permute.xlu0 %1429 }
0x1d63   :  { %v2803_v7 = vmul.f32 %v1430_v63, %v1415_v59 }
0x1d65   :  { %1442 = vrot.lane.b32.xlu1 %v2803_v7, %s2336_s2 }
0x1dd7   :  { %v1443_v21 = vpop.permute.xlu1 %1442 }
0x1dd8   :  { %2136 = vmatmul.mubr.msk.f32.vlgmr.msra.gmra.mxu1 %vm166_vm4, %v1443_v21 }
0x1dd9   :  { %2150 = vmatpush3.msra.mxu1 %v2654_v8  ;;  %2157 = vmatprep.mubr.msk.f32.mxu1 %vm2338_vm3, %v2337_v22 }
0x1dda   :  { %2151 = vmatprep.subr.mxu1 %v2337_v22 }
0x1ddb   :  { %2152 = vmatpush3.msra.mxu1 %v2657_v10 }
0x1ddc   :  { %2153 = vmatprep.subr.mxu1 %v2337_v22 }
0x1ddd   :  { %2154 = vmatpush3.msra.mxu1 %v2661_v11 }
0x1dde   :  { %2155 = vmatprep.subr.mxu1 %v2337_v22 }
0x1ddf   :  { %2156 = vmatpush3.msra.mxu1 %v2666_v12 }
0x1e98   :  { %v1512_v23 = vpop.f32.mrf.mxu1 }
0x1e99   :  { %v1516_v8 = vadd.f32 %v1512_v23, %v969_v13  ;;  %v1113_v13 = vsel %vm1112_vm9, 1, %v2334_v0  ;;  %v1220_v23 = vsel %vm1219_vm10, 1, %v2334_v0 }
0x1e9a   :  { %v2137_v24 = vpop.f32.mrf.mxu1 }
0x1e9b   :  { %v1517_v16 = vmul.f32 0.5, %v1516_v8  ;;  %v1648_v24 = vsel %vm1647_vm12, 1, %v2334_v0 }
0x1e9d   :  { %v1518_v25 = vsel %vm2427_vm2, %v1516_v8, %v1517_v16  ;;  %v1434_v8 = vsel %vm1433_vm11, 1, %v2334_v0  ;;  %v1769_v0 = vld [vmem:[%s2911_s8 + $0x8] sm:$0xff] }
0x1e9e   :  { %2250 = vtanh.f32 %v1518_v25 }
0x1eab   :  { %v2251_v10 = vpop.eup %2250 }
0x1eac   :  { %v1520_v17 = vmul.f32 0.5, %v2251_v10 }
0x1eae   :  { %v1521_v18 = vadd.f32 0.5, %v1520_v17  ;;  %v1771_v17 = vld [vmem:[%s2911_s8 + $0x18] sm:$0xff] }
0x1eb0   :  { %v1522_v11 = vsel %vm2427_vm2, %v2251_v10, %v1521_v18  ;;  %v1770_v18 = vld [vmem:[%s2911_s8 + $0x10] sm:$0xff] }
0x1eb1   :  { %1525 = vrot.lane.b32.xlu0 %v1522_v11, %s2335_s0  ;;  %v1523_v20 = vmul.f32 %v1522_v11, %v1426_v3  ;;  %v70_v3 = vmax.f32 %v69_v60, 1.0 }
0x1f23   :  { %v1526_v12 = vpop.permute.xlu0 %1525 }
0x1f24   :  { %v1528_v19 = vmul.f32 %v1526_v12, %v1522_v11 }
0x1f26   :  { %1530 = vrot.lane.b32.xlu1 %v1528_v19, %s2336_s2 }
0x1f98   :  { %v1531_v26 = vpop.permute.xlu1 %1530 }
0x1f99   :  { %v1533_v28 = vadd.f32 %v1531_v26, %v1523_v20 }
0x1f9b   :  { %2252 = vtanh.f32 %v1533_v28 }
0x1fa8   :  { %v2253_v29 = vpop.eup %2252 }
0x1fa9   :  { %1536 = vrot.lane.b32.xlu0 %v2253_v29, %s2335_s0 }
0x201b   :  { %v1537_v31 = vpop.permute.xlu0 %1536 }
0x201c   :  { %v2826_v34 = vmul.f32 %v1537_v31, %v1522_v11  ;;  %v1768_v11 = vld [vmem:[%s2911_s8] sm:$0xff] }
0x201e   :  { %1549 = vrot.lane.b32.xlu1 %v2826_v34, %s2336_s2 }
0x2090   :  { %v1550_v35 = vpop.permute.xlu1 %1549 }
0x2091   :  { %2147 = vmatmul.mubr.msk.f32.vlgmr.msra.gmra.mxu0 %vm166_vm4, %v1550_v35 }
0x2092   :  { %2168 = vmatprep.mubr.msk.f32.mxu0 %vm2338_vm3, %v2337_v22  ;;  %2161 = vmatpush3.msra.mxu0 %v1771_v17 }
0x2093   :  { %2162 = vmatprep.subr.mxu0 %v2337_v22 }
0x2094   :  { %2163 = vmatpush3.msra.mxu0 %v1770_v18 }
0x2095   :  { %2164 = vmatprep.subr.mxu0 %v2337_v22 }
0x2096   :  { %2165 = vmatpush3.msra.mxu0 %v1769_v0 }
0x2097   :  { %2166 = vmatprep.subr.mxu0 %v2337_v22 }
0x2098   :  { %2167 = vmatpush3.msra.mxu0 %v1768_v11 }
0x2151   :  { %v1619_v30 = vpop.f32.mrf.mxu0 }
0x2152   :  { %v1623_v37 = vadd.f32 %v1619_v30, %v974_v36 }
0x2153   :  { %v2148_v38 = vpop.f32.mrf.mxu0 }
0x2154   :  { %v1624_v39 = vmul.f32 0.5, %v1623_v37 }
0x2156   :  { %v1625_v40 = vsel %vm2427_vm2, %v1623_v37, %v1624_v39 }
0x2157   :  { %2254 = vtanh.f32 %v1625_v40 }
0x2164   :  { %v2255_v52 = vpop.eup %2254 }
0x2165   :  { %v1627_v42 = vmul.f32 0.5, %v2255_v52 }
0x2167   :  { %v1628_v15 = vadd.f32 0.5, %v1627_v42 }
0x2169   :  { %v1629_v44 = vsel %vm2427_vm2, %v2255_v52, %v1628_v15 }
0x216a   :  { %1632 = vrot.lane.b32.xlu0 %v1629_v44, %s2335_s0  ;;  %v1630_v33 = vmul.f32 %v1629_v44, %v1533_v28 }
0x21dc   :  { %v1633_v45 = vpop.permute.xlu0 %1632 }
0x21dd   :  { %v1635_v46 = vmul.f32 %v1633_v45, %v1629_v44 }
0x21df   :  { %1637 = vrot.lane.b32.xlu1 %v1635_v46, %s2336_s2 }
0x2251   :  { %v1638_v47 = vpop.permute.xlu1 %1637 }
0x2252   :  { %v1640_v1 = vadd.f32 %v1638_v47, %v1630_v33 }
0x2254   :  { %2256 = vtanh.f32 %v1640_v1 }
0x2261   :  { %v2257_v48 = vpop.eup %2256 }
0x2262   :  { %1643 = vrot.lane.b32.xlu0 %v2257_v48, %s2335_s0 }
0x22d4   :  { %v1644_v50 = vpop.permute.xlu0 %1643 }
0x22d5   :  { %v2842_v51 = vmul.f32 %v1644_v50, %v1629_v44 }
0x22d7   :  { %1656 = vrot.lane.b32.xlu1 %v2842_v51, %s2336_s2 }
0x2349   :  { %v1657_v4 = vpop.permute.xlu1 %1656 }
0x234a   :  { %2158 = vmatmul.mubr.msk.f32.vlgmr.msra.gmra.mxu1 %vm166_vm4, %v1657_v4 }
0x240a   :  { %v1726_v53 = vpop.f32.mrf.mxu1 }
0x240b   :  { %v1730_v54 = vadd.f32 %v1726_v53, %v979_v5 }
0x240c   :  { %v2159_v55 = vpop.f32.mrf.mxu1 }
0x240d   :  { %v1731_v56 = vmul.f32 0.5, %v1730_v54 }
0x240f   :  { %v1732_v57 = vsel %vm2427_vm2, %v1730_v54, %v1731_v56 }
0x2410   :  { %2258 = vtanh.f32 %v1732_v57 }
0x2411   :  { %2260 = vrcp.f32 %v70_v3 }
0x241d   :  { %v2259_v58 = vpop.eup %2258 }
0x241e   :  { %v1734_v59 = vmul.f32 0.5, %v2259_v58  ;;  %v2261_v6 = vpop.eup %2260 }
0x2420   :  { %v1735_v61 = vadd.f32 0.5, %v1734_v59 }
0x2422   :  { %v2856_v62 = vsel %vm2427_vm2, %v2259_v58, %v1735_v61 }
0x2423   :  { %1739 = vrot.lane.b32.xlu0 %v2856_v62, %s2335_s0  ;;  %v1737_v16 = vmul.f32 %v2856_v62, %v1640_v1 }
0x2427   :  { %1008 = vperm.xlu0 %2196, %v1006_v43  }
0x242b   :  { %1329 = vperm.xlu0 %2196, %v1327_v32  }
0x242f   :  { %1543 = vperm.xlu0 %2196, %v1541_v2  }
0x2433   :  { %1757 = vperm.xlu0 %2196, %v1755_v9  }
0x2437   :  { %1764 = vperm.xlu0 %2196, %v2261_v6  }
0x2495   :  { %v1740_v63 = vpop.permute.xlu0 %1739 }
0x2496   :  { %v1742_v21 = vmul.f32 %v1740_v63, %v2856_v62 }
0x2498   :  { %1744 = vrot.lane.b32.xlu1 %v1742_v21, %s2336_s2 }
0x249c   :  { %1115 = vperm.xlu1 %2197, %v1113_v13  }
0x24a0   :  { %1222 = vperm.xlu1 %2197, %v1220_v23  }
0x24a2   :  { %v1009_v20 = vpop.permute.xlu0 %1008 }
0x24a3   :  { %vm1010_vm14 = vcmp.eq.s32.totalorder %v1009_v20, 1 }
0x24a4   :  { %1436 = vperm.xlu1 %2197, %v1434_v8   ;;  %v1011_v29 = vsel %vm1010_vm14, %v2671_v14, 0.0 }
0x24a6   :  { %v1330_v31 = vpop.permute.xlu0 %1329 }
0x24a7   :  { %vm1331_vm0 = vcmp.eq.s32.totalorder %v1330_v31, 1 }
0x24a8   :  { %1650 = vperm.xlu1 %2197, %v1648_v24   ;;  %v1332_v22 = vsel %vm1331_vm0, %v2780_v49, 0.0 }
0x24aa   :  { %v1544_v39 = vpop.permute.xlu0 %1543 }
0x24ab   :  { %vm1545_vm2 = vcmp.eq.s32.totalorder %v1544_v39, 1 }
0x24ac   :  { %v1546_v14 = vsel %vm1545_vm2, %v2826_v34, 0.0  ;;  %v1897_v34 = vld [vmem:[%s2912_s9] ss:$0 sm:$0xff] }
0x24ae   :  { %v1758_v15 = vpop.permute.xlu0 %1757 }
0x24af   :  { %vm1759_vm5 = vcmp.eq.s32.totalorder %v1758_v15, 1 }
0x24b2   :  { %v1765_v47 = vpop.permute.xlu0 %1764 }
0x250a   :  { %v1745_v25 = vpop.permute.xlu1 %1744 }
0x250b   :  { %v1747_v10 = vadd.f32 %v1745_v25, %v1737_v16 }
0x250d   :  { %2262 = vtanh.f32 %v1747_v10 }
0x2517   :  { %v1116_v19 = vpop.permute.xlu1 %1115 }
0x2518   :  { %vm1117_vm13 = vcmp.eq.s32.totalorder %v1116_v19, 1 }
0x2519   :  { %v1118_v28 = vsel %vm1117_vm13, %v2713_v41, 0.0 }
0x251a   :  { %v2263_v12 = vpop.eup %2262  ;;  %v1119_v36 = vadd.f32 %v1118_v28, %v1011_v29 }
0x251b   :  { %1750 = vrot.lane.b32.xlu1 %v2263_v12, %s2335_s0  ;;  %v1223_v26 = vpop.permute.xlu1 %1222 }
0x251c   :  { %vm1224_vm15 = vcmp.eq.s32.totalorder %v1223_v26, 1 }
0x251d   :  { %v1225_v35 = vsel %vm1224_vm15, %v2751_v27, 0.0 }
0x251e   :  { %v1226_v37 = vadd.f32 %v1225_v35, %v1119_v36 }
0x251f   :  { %v1437_v30 = vpop.permute.xlu1 %1436 }
0x2520   :  { %vm1438_vm1 = vcmp.eq.s32.totalorder %v1437_v30, 1  ;;  %v1333_v38 = vadd.f32 %v1332_v22, %v1226_v37 }
0x2521   :  { %v1439_v40 = vsel %vm1438_vm1, %v2803_v7, 0.0 }
0x2522   :  { %v1440_v42 = vadd.f32 %v1439_v40, %v1333_v38 }
0x2523   :  { %v1651_v52 = vpop.permute.xlu1 %1650 }
0x2524   :  { %vm1652_vm3 = vcmp.eq.s32.totalorder %v1651_v52, 1  ;;  %v1547_v41 = vadd.f32 %v1546_v14, %v1440_v42 }
0x2525   :  { %v1653_v27 = vsel %vm1652_vm3, %v2842_v51, 0.0 }
0x2526   :  { %v1654_v46 = vadd.f32 %v1653_v27, %v1547_v41 }
0x258d   :  { %v1751_v44 = vpop.permute.xlu1 %1750 }
0x258e   :  { %v1753_v45 = vmul.f32 %v1751_v44, %v2856_v62 }
0x2590   :  { %v1760_v49 = vsel %vm1759_vm5, %v1753_v45, 0.0 }
0x2591   :  { %v1761_v33 = vadd.f32 %v1760_v49, %v1654_v46 }
0x2593   :  { %v1767_v1 = vmul.f32 %v1765_v47, %v1761_v33 }
0x2595   :  { %1780 = vrot.lane.b32.xlu1 %v1767_v1, %s2336_s2 }
0x2607   :  { %v1781_v7 = vpop.permute.xlu1 %1780 }
0x2608   :  { %2169 = vmatmul.mubr.msk.f32.vlgmr.msra.gmra.mxu0 %vm166_vm4, %v1781_v7 }
0x26c8   :  { %v1850_v48 = vpop.f32.mrf.mxu0 }
0x26c9   :  { %v1851_v50 = vadd.f32 %v1897_v34, %v1850_v48 }
0x26ca   :  { %v2170_v51 = vpop.f32.mrf.mxu0 }
0x26cb   :  { %1855 = vst.msk [vmem:[#allocation7] sm:$0xff] %vm1854_vm6, %v1851_v50 }
0x26cc   :  { %2315 = shalt.err (!%p2312_p0)
}
0x26cd   :  { %1865 = dma.vmem_to_hbm [thread:$0]  %s1863_s26, 128, %s2913_s10, [#allocation4]  }
0x26ce   :  { %2328 = dma.done.wait [#allocation4], 128  }
0x26cf   :  { %2329 = vsyncadd [#allocation4], 4294967168 }
0x26d0   :  { %1869 = vsyncpa [#allocation3], 1 }
0x26d1   :  { %1870 = vsyncpa [#allocation6], 1 }
0x26d2   :  { %1871 = vsyncpa [#allocation4], 1 }

</bundles_post_ra>
